<compile_context>
chip_gen: v5e
topology: v5e:2x2
jax: 0.10.0
libtpu: 0.0.40
codegen_flags: <defaults>
</compile_context>

<pallas_src>
import jax
import jax.numpy as jnp
from jax.experimental import pallas as pl
from jax.experimental.pallas import tpu as pltpu


def _make_kernel(TH, W, Cb, k, use_halo, out_is_f32):
    """Tap-accumulation kernel for one (1, TH, W, Cb) NHWC output block."""
    p = (k - 1) // 2
    f32 = jnp.float32

    def kernel(*refs):
        if use_halo:
            w_ref, x_ref, top_ref, bot_ref, o_ref = refs[:5]
            rest = refs[5:]
        else:
            w_ref, x_ref, o_ref = refs[:3]
            rest = refs[3:]
        # Accumulate straight into the output block when it is f32, otherwise
        # into an explicit f32 VMEM scratch (single cast/store at the end).
        acc_ref = o_ref if out_is_f32 else rest[0]

        # Hoist the k*k scalar weight reads (SMEM) out of the tap loops.
        w = [w_ref[t] for t in range(k * k)]

        if use_halo:
            h = pl.program_id(2)
            last_h = pl.num_programs(2) - 1
            # p-row halos from the neighbouring H-tiles.  At the image border
            # the (index-clamped) loaded rows are replaced by exact zeros so
            # the conv's zero 'same' padding is preserved.  (p rows only.)
            top = jnp.where(h > 0, top_ref[0],
                            jnp.zeros((p, W, Cb), top_ref.dtype)).astype(f32)
            bot = jnp.where(h < last_h, bot_ref[0],
                            jnp.zeros((p, W, Cb), bot_ref.dtype)).astype(f32)

        # Centre tap initialises the accumulator: one full-width, lane-dense,
        # unmasked store.  No scratch zeroing pass, no interior halo copy.
        acc_ref[0] = w[p * k + p] * x_ref[0].astype(f32)

        for di in range(-p, p + 1):
            for dj in range(-p, p + 1):
                if di == 0 and dj == 0:
                    continue
                wv = w[(di + p) * k + (dj + p)]
                # Static column clipping == zero 'same' padding left/right.
                c_lo, c_hi = max(0, -dj), min(W, W - dj)
                if c_hi <= c_lo:
                    continue
                s_lo, s_hi = c_lo + dj, c_hi + dj
                # Rows sourced from this tile (row clipping == zero padding
                # when the tile touches the image top/bottom or no halo).
                r_lo, r_hi = max(0, -di), min(TH, TH - di)
                if r_hi > r_lo:
                    acc_ref[0, r_lo:r_hi, c_lo:c_hi, :] += (
                        wv * x_ref[0, r_lo + di:r_hi + di, s_lo:s_hi, :].astype(f32))
                if use_halo and di < 0:
                    # First -di output rows read from the tile above.
                    acc_ref[0, 0:-di, c_lo:c_hi, :] += (
                        wv * top[p + di:p, s_lo:s_hi, :])
                if use_halo and di > 0:
                    # Last di output rows read from the tile below.
                    acc_ref[0, TH - di:TH, c_lo:c_hi, :] += (
                        wv * bot[0:di, s_lo:s_hi, :])

        if not out_is_f32:
            o_ref[0] = acc_ref[0].astype(o_ref.dtype)

    return kernel


def _vmem_budgets():
    """Per-generation VMEM sizing (v7x: 64 MiB/TC; v5e/v6e: 128 MiB)."""
    try:
        cap = int(pltpu.get_tpu_info().vmem_capacity_bytes)
    except Exception:
        cap = 64 * 1024 * 1024                 # conservative (v7x-sized) fallback
    # Per-grid-step working set (2x in + 2x out + halos + acc), with headroom
    # for Mosaic-internal scratch: ~25 MiB on v7x, ~48 MiB on v5e/v6e.
    step_budget = min(int(cap * 0.40), 48 * 1024 * 1024)
    # Scoped VMEM limit handed to Mosaic: 48 MiB on v7x, 96 MiB on v5e/v6e.
    vmem_limit = min(int(cap * 0.75), 96 * 1024 * 1024)
    return step_budget, vmem_limit


def _pick_tiles(N, H, W, C, k, in_isz, out_isz, step_budget):
    """Choose (channel block, H block) so the pipelined working set fits VMEM."""
    p = (k - 1) // 2

    if C % 128 == 0:
        cb_cands = [cb for cb in (512, 256, 128) if C % cb == 0]
    else:
        # Small / ragged C (e.g. GCA-Net's C=64): keep the lane dim whole.
        cb_cands = [C]

    def h_cands():
        # Divisors of H, largest first; tiled candidates must be multiples of
        # p so the p-row halo blocks tile H exactly.
        cands = [H]
        for th in range(H - 1, 0, -1):
            if H % th == 0 and (p == 0 or th % p == 0):
                cands.append(th)
        return cands

    def step_bytes(cb, th, halo):
        b = 2 * th * W * cb * in_isz            # double-buffered input block
        b += 2 * th * W * cb * out_isz          # double-buffered output block
        if halo:
            b += 2 * 2 * p * W * cb * in_isz    # two double-buffered p-row halos
        if out_isz != 4:
            b += th * W * cb * 4                # f32 accumulator scratch
        return b

    def fits(cb, th):
        return step_bytes(cb, th, halo=(p > 0 and th < H)) <= step_budget

    choice = None
    for cb in cb_cands:
        for th in h_cands():
            if fits(cb, th):
                choice = (cb, th)
                break
        if choice is not None:
            break
    if choice is None:
        # Nothing fits the budget: take the smallest block (correctness first).
        choice = (cb_cands[-1], min(h_cands()))

    cb, th = choice
    # Megacore (v7x has 2 TensorCores): expose >= 2 independent grid steps.
    if N * (C // cb) * (H // th) < 2:
        for th2 in h_cands()[1:]:
            if fits(cb, th2):
                return cb, th2
    return cb, th


def share_sep_conv_nhwc(x_nhwc, weight, *, cb=None, th=None):
    """NHWC ShareSepConv.  x_nhwc: (N, H, W, C); weight: (1, 1, k, k)."""
    N, H, W, C = x_nhwc.shape
    k = weight.shape[-1]
    assert k % 2 == 1, "kernel size should be odd"
    p = (k - 1) // 2

    step_budget, vmem_limit = _vmem_budgets()
    auto_cb, auto_th = _pick_tiles(N, H, W, C, k, x_nhwc.dtype.itemsize,
                                   x_nhwc.dtype.itemsize, step_budget)
    cb = auto_cb if cb is None else cb
    th = auto_th if th is None else th
    assert C % cb == 0 and H % th == 0

    use_halo = (th < H) and (p > 0)
    if use_halo:
        assert th % p == 0 and H % p == 0, "H tile must be a multiple of the halo"

    out_is_f32 = x_nhwc.dtype == jnp.float32
    w_flat = weight.reshape(-1).astype(jnp.float32)

    in_specs = [
        # shared k*k weights, whole array resident in SMEM
        pl.BlockSpec(memory_space=pltpu.MemorySpace.SMEM),
        # one (batch, H-tile, channel-block) NHWC slab per grid step
        pl.BlockSpec((1, th, W, cb), lambda n, c, h: (n, h, 0, c)),
    ]
    inputs = [w_flat, x_nhwc]
    if use_halo:
        r = th // p          # H-tile size measured in p-row halo blocks
        nhb = H // p         # number of p-row blocks in the image
        in_specs += [
            # p rows just above / below this tile; index clamped at the image
            # border (the kernel swaps those rows for exact zeros).
            pl.BlockSpec((1, p, W, cb),
                         lambda n, c, h: (n, jnp.maximum(h * r - 1, 0), 0, c)),
            pl.BlockSpec((1, p, W, cb),
                         lambda n, c, h: (n, jnp.minimum((h + 1) * r, nhb - 1), 0, c)),
        ]
        inputs += [x_nhwc, x_nhwc]

    scratch_shapes = [] if out_is_f32 else [pltpu.VMEM((1, th, W, cb), jnp.float32)]

    return pl.pallas_call(
        _make_kernel(th, W, cb, k, use_halo, out_is_f32),
        out_shape=jax.ShapeDtypeStruct((N, H, W, C), x_nhwc.dtype),
        grid_spec=pltpu.PrefetchScalarGridSpec(
            num_scalar_prefetch=0,
            grid=(N, C // cb, H // th),
            in_specs=in_specs,
            out_specs=pl.BlockSpec((1, th, W, cb), lambda n, c, h: (n, h, 0, c)),
            scratch_shapes=scratch_shapes,
        ),
        compiler_params=pltpu.CompilerParams(
            dimension_semantics=("parallel", "parallel", "parallel"),
            vmem_limit_bytes=vmem_limit,
        ),
    )(*inputs)


def share_sep_conv(x, weight):
    """PyTorch-facing NCHW wrapper.  x: (N, C, H, W); weight: (1, 1, k, k)."""
    # Layout plumbing only; in a full network keep NHWC end-to-end and call
    # share_sep_conv_nhwc directly so these two full-tensor transposes vanish.
    x_nhwc = jnp.transpose(x, (0, 2, 3, 1))
    out_nhwc = share_sep_conv_nhwc(x_nhwc, weight)
    return jnp.transpose(out_nhwc, (0, 3, 1, 2))


def _reference(x, weight):
    # Pure-JAX reference: padded-shift accumulation (== F.conv2d with groups=C
    # and the shared (1,1,k,k) weight expanded across channels).
    N, C, H, W = x.shape
    k = weight.shape[-1]
    p = (k - 1) // 2
    xp = jnp.pad(x, ((0, 0), (0, 0), (p, p), (p, p)))
    out = jnp.zeros(x.shape, jnp.float32)
    for i in range(k):
        for j in range(k):
            out = out + weight[0, 0, i, j] * xp[:, :, i:i + H, j:j + W].astype(jnp.float32)
    return out.astype(x.dtype)


if __name__ == "__main__":
    key = jax.random.PRNGKey(0)
    k_x, k_w3, k_w5, k_xb = jax.random.split(key, 4)

    N, C, H, W = 2, 4, 16, 16
    x = jax.random.normal(k_x, (N, C, H, W), dtype=jnp.float32)
    x_nhwc = jnp.transpose(x, (0, 2, 3, 1))

    # --- Test 1: identity-init weight (exactly the PyTorch __init__), auto tiling.
    ks = 3
    w_id = jnp.zeros((1, 1, ks, ks), jnp.float32).at[0, 0, 1, 1].set(1.0)
    out = jax.block_until_ready(share_sep_conv(x, w_id))
    ref = _reference(x, w_id)
    assert out.shape == (N, C, H, W)
    assert jnp.allclose(out, ref, atol=1e-5, rtol=1e-5)
    assert jnp.allclose(out, x, atol=1e-5, rtol=1e-5)   # identity at init

    # --- Test 2: arbitrary k=3 weights with FORCED H-tiling (halo path, p=1).
    w3 = jax.random.normal(k_w3, (1, 1, 3, 3), dtype=jnp.float32)
    out3 = jax.block_until_ready(share_sep_conv_nhwc(x_nhwc, w3, cb=4, th=8))
    out3 = jnp.transpose(out3, (0, 3, 1, 2))
    assert jnp.allclose(out3, _reference(x, w3), atol=1e-4, rtol=1e-4)

    # --- Test 3: arbitrary k=5 weights, forced H-tiling (p=2 halos).
    w5 = jax.random.normal(k_w5, (1, 1, 5, 5), dtype=jnp.float32)
    out5 = jax.block_until_ready(share_sep_conv_nhwc(x_nhwc, w5, cb=4, th=8))
    out5 = jnp.transpose(out5, (0, 3, 1, 2))
    assert jnp.allclose(out5, _reference(x, w5), atol=1e-4, rtol=1e-4)

    # --- Test 4: lane-dense channels with channel tiling + H tiling, k=3.
    xb = jax.random.normal(k_xb, (1, 256, 16, 16), dtype=jnp.float32)
    xb_nhwc = jnp.transpose(xb, (0, 2, 3, 1))
    outb = jax.block_until_ready(share_sep_conv_nhwc(xb_nhwc, w3, cb=128, th=8))
    outb = jnp.transpose(outb, (0, 3, 1, 2))
    assert jnp.allclose(outb, _reference(xb, w3), atol=1e-4, rtol=1e-4)

    print("KERNEL_OK")
</pallas_src>

<mosaic_0001>
module attributes {stable_mosaic.version = 11 : i64} {
  func.func @kernel(%arg0: i32, %arg1: i32, %arg2: i32, %arg3: memref<9xf32, #tpu.memory_space<smem>>, %arg4: memref<1x16x16x4xf32, #tpu.memory_space<vmem>>, %arg5: memref<1x16x16x4xf32, #tpu.memory_space<vmem>>) attributes {dimension_semantics = [#tpu.dimension_semantics<parallel>, #tpu.dimension_semantics<parallel>, #tpu.dimension_semantics<parallel>], iteration_bounds = array<i64: 2, 1, 1>, scalar_prefetch = 0 : i64, scratch_operands = 0 : i64, tpu.core_type = #tpu.core_type<tc>, window_params = [{transform_indices = @transform_0, window_bounds = array<i64: 9>}, {transform_indices = @transform_1, window_bounds = array<i64: 1, 16, 16, 4>}, {transform_indices = @transform_2, window_bounds = array<i64: 1, 16, 16, 4>}]} {
    %c0 = arith.constant 0 : index
    %0 = memref.load %arg3[%c0] : memref<9xf32, #tpu.memory_space<smem>>
    %c1 = arith.constant 1 : index
    %1 = memref.load %arg3[%c1] : memref<9xf32, #tpu.memory_space<smem>>
    %c2 = arith.constant 2 : index
    %2 = memref.load %arg3[%c2] : memref<9xf32, #tpu.memory_space<smem>>
    %c3 = arith.constant 3 : index
    %3 = memref.load %arg3[%c3] : memref<9xf32, #tpu.memory_space<smem>>
    %c4 = arith.constant 4 : index
    %4 = memref.load %arg3[%c4] : memref<9xf32, #tpu.memory_space<smem>>
    %c5 = arith.constant 5 : index
    %5 = memref.load %arg3[%c5] : memref<9xf32, #tpu.memory_space<smem>>
    %c6 = arith.constant 6 : index
    %6 = memref.load %arg3[%c6] : memref<9xf32, #tpu.memory_space<smem>>
    %c7 = arith.constant 7 : index
    %7 = memref.load %arg3[%c7] : memref<9xf32, #tpu.memory_space<smem>>
    %c8 = arith.constant 8 : index
    %8 = memref.load %arg3[%c8] : memref<9xf32, #tpu.memory_space<smem>>
    %c0_0 = arith.constant 0 : index
    %c0_1 = arith.constant 0 : index
    %c0_2 = arith.constant 0 : index
    %c0_3 = arith.constant 0 : index
    %9 = vector.load %arg4[%c0_0, %c0_1, %c0_2, %c0_3] : memref<1x16x16x4xf32, #tpu.memory_space<vmem>>, vector<1x16x16x4xf32>
    %10 = vector.shape_cast %9 : vector<1x16x16x4xf32> to vector<16x16x4xf32>
    %11 = vector.broadcast %4 : f32 to vector<16x16x4xf32>
    %12 = arith.mulf %11, %10 : vector<16x16x4xf32>
    %c0_4 = arith.constant 0 : index
    %c0_5 = arith.constant 0 : index
    %c0_6 = arith.constant 0 : index
    %c0_7 = arith.constant 0 : index
    %13 = vector.load %arg5[%c0_4, %c0_5, %c0_6, %c0_7] : memref<1x16x16x4xf32, #tpu.memory_space<vmem>>, vector<1x16x16x4xf32>
    %14 = vector.shape_cast %13 : vector<1x16x16x4xf32> to vector<16x16x4xf32>
    %15 = vector.shape_cast %12 : vector<16x16x4xf32> to vector<1x16x16x4xf32>
    tpu.vector_store %arg5[%c0_4, %c0_5, %c0_6, %c0_7], %15 {strides = array<i32>} : memref<1x16x16x4xf32, #tpu.memory_space<vmem>>, vector<1x16x16x4xf32>,
    %c0_8 = arith.constant 0 : index
    %c1_9 = arith.constant 1 : index
    %c1_10 = arith.constant 1 : index
    %c0_11 = arith.constant 0 : index
    %16 = vector.load %arg5[%c0_8, %c1_9, %c1_10, %c0_11] : memref<1x16x16x4xf32, #tpu.memory_space<vmem>>, vector<1x15x15x4xf32>
    %17 = vector.shape_cast %16 : vector<1x15x15x4xf32> to vector<15x15x4xf32>
    %c0_12 = arith.constant 0 : index
    %c0_13 = arith.constant 0 : index
    %c0_14 = arith.constant 0 : index
    %c0_15 = arith.constant 0 : index
    %18 = vector.load %arg4[%c0_12, %c0_13, %c0_14, %c0_15] : memref<1x16x16x4xf32, #tpu.memory_space<vmem>>, vector<1x15x15x4xf32>
    %19 = vector.shape_cast %18 : vector<1x15x15x4xf32> to vector<15x15x4xf32>
    %20 = vector.broadcast %0 : f32 to vector<15x15x4xf32>
    %21 = arith.mulf %20, %19 : vector<15x15x4xf32>
    %22 = arith.addf %17, %21 : vector<15x15x4xf32>
    %c0_16 = arith.constant 0 : index
    %c1_17 = arith.constant 1 : index
    %c1_18 = arith.constant 1 : index
    %c0_19 = arith.constant 0 : index
    %23 = vector.load %arg5[%c0_16, %c1_17, %c1_18, %c0_19] : memref<1x16x16x4xf32, #tpu.memory_space<vmem>>, vector<1x15x15x4xf32>
    %24 = vector.shape_cast %23 : vector<1x15x15x4xf32> to vector<15x15x4xf32>
    %25 = vector.shape_cast %22 : vector<15x15x4xf32> to vector<1x15x15x4xf32>
    tpu.vector_store %arg5[%c0_16, %c1_17, %c1_18, %c0_19], %25 {strides = array<i32>} : memref<1x16x16x4xf32, #tpu.memory_space<vmem>>, vector<1x15x15x4xf32>,
    %c0_20 = arith.constant 0 : index
    %c1_21 = arith.constant 1 : index
    %c0_22 = arith.constant 0 : index
    %c0_23 = arith.constant 0 : index
    %26 = vector.load %arg5[%c0_20, %c1_21, %c0_22, %c0_23] : memref<1x16x16x4xf32, #tpu.memory_space<vmem>>, vector<1x15x16x4xf32>
    %27 = vector.shape_cast %26 : vector<1x15x16x4xf32> to vector<15x16x4xf32>
    %c0_24 = arith.constant 0 : index
    %c0_25 = arith.constant 0 : index
    %c0_26 = arith.constant 0 : index
    %c0_27 = arith.constant 0 : index
    %28 = vector.load %arg4[%c0_24, %c0_25, %c0_26, %c0_27] : memref<1x16x16x4xf32, #tpu.memory_space<vmem>>, vector<1x15x16x4xf32>
    %29 = vector.shape_cast %28 : vector<1x15x16x4xf32> to vector<15x16x4xf32>
    %30 = vector.broadcast %1 : f32 to vector<15x16x4xf32>
    %31 = arith.mulf %30, %29 : vector<15x16x4xf32>
    %32 = arith.addf %27, %31 : vector<15x16x4xf32>
    %c0_28 = arith.constant 0 : index
    %c1_29 = arith.constant 1 : index
    %c0_30 = arith.constant 0 : index
    %c0_31 = arith.constant 0 : index
    %33 = vector.load %arg5[%c0_28, %c1_29, %c0_30, %c0_31] : memref<1x16x16x4xf32, #tpu.memory_space<vmem>>, vector<1x15x16x4xf32>
    %34 = vector.shape_cast %33 : vector<1x15x16x4xf32> to vector<15x16x4xf32>
    %35 = vector.shape_cast %32 : vector<15x16x4xf32> to vector<1x15x16x4xf32>
    tpu.vector_store %arg5[%c0_28, %c1_29, %c0_30, %c0_31], %35 {strides = array<i32>} : memref<1x16x16x4xf32, #tpu.memory_space<vmem>>, vector<1x15x16x4xf32>,
    %c0_32 = arith.constant 0 : index
    %c1_33 = arith.constant 1 : index
    %c0_34 = arith.constant 0 : index
    %c0_35 = arith.constant 0 : index
    %36 = vector.load %arg5[%c0_32, %c1_33, %c0_34, %c0_35] : memref<1x16x16x4xf32, #tpu.memory_space<vmem>>, vector<1x15x15x4xf32>
    %37 = vector.shape_cast %36 : vector<1x15x15x4xf32> to vector<15x15x4xf32>
    %c0_36 = arith.constant 0 : index
    %c0_37 = arith.constant 0 : index
    %c1_38 = arith.constant 1 : index
    %c0_39 = arith.constant 0 : index
    %38 = vector.load %arg4[%c0_36, %c0_37, %c1_38, %c0_39] : memref<1x16x16x4xf32, #tpu.memory_space<vmem>>, vector<1x15x15x4xf32>
    %39 = vector.shape_cast %38 : vector<1x15x15x4xf32> to vector<15x15x4xf32>
    %40 = vector.broadcast %2 : f32 to vector<15x15x4xf32>
    %41 = arith.mulf %40, %39 : vector<15x15x4xf32>
    %42 = arith.addf %37, %41 : vector<15x15x4xf32>
    %c0_40 = arith.constant 0 : index
    %c1_41 = arith.constant 1 : index
    %c0_42 = arith.constant 0 : index
    %c0_43 = arith.constant 0 : index
    %43 = vector.load %arg5[%c0_40, %c1_41, %c0_42, %c0_43] : memref<1x16x16x4xf32, #tpu.memory_space<vmem>>, vector<1x15x15x4xf32>
    %44 = vector.shape_cast %43 : vector<1x15x15x4xf32> to vector<15x15x4xf32>
    %45 = vector.shape_cast %42 : vector<15x15x4xf32> to vector<1x15x15x4xf32>
    tpu.vector_store %arg5[%c0_40, %c1_41, %c0_42, %c0_43], %45 {strides = array<i32>} : memref<1x16x16x4xf32, #tpu.memory_space<vmem>>, vector<1x15x15x4xf32>,
    %c0_44 = arith.constant 0 : index
    %c0_45 = arith.constant 0 : index
    %c1_46 = arith.constant 1 : index
    %c0_47 = arith.constant 0 : index
    %46 = vector.load %arg5[%c0_44, %c0_45, %c1_46, %c0_47] : memref<1x16x16x4xf32, #tpu.memory_space<vmem>>, vector<1x16x15x4xf32>
    %47 = vector.shape_cast %46 : vector<1x16x15x4xf32> to vector<16x15x4xf32>
    %c0_48 = arith.constant 0 : index
    %c0_49 = arith.constant 0 : index
    %c0_50 = arith.constant 0 : index
    %c0_51 = arith.constant 0 : index
    %48 = vector.load %arg4[%c0_48, %c0_49, %c0_50, %c0_51] : memref<1x16x16x4xf32, #tpu.memory_space<vmem>>, vector<1x16x15x4xf32>
    %49 = vector.shape_cast %48 : vector<1x16x15x4xf32> to vector<16x15x4xf32>
    %50 = vector.broadcast %3 : f32 to vector<16x15x4xf32>
    %51 = arith.mulf %50, %49 : vector<16x15x4xf32>
    %52 = arith.addf %47, %51 : vector<16x15x4xf32>
    %c0_52 = arith.constant 0 : index
    %c0_53 = arith.constant 0 : index
    %c1_54 = arith.constant 1 : index
    %c0_55 = arith.constant 0 : index
    %53 = vector.load %arg5[%c0_52, %c0_53, %c1_54, %c0_55] : memref<1x16x16x4xf32, #tpu.memory_space<vmem>>, vector<1x16x15x4xf32>
    %54 = vector.shape_cast %53 : vector<1x16x15x4xf32> to vector<16x15x4xf32>
    %55 = vector.shape_cast %52 : vector<16x15x4xf32> to vector<1x16x15x4xf32>
    tpu.vector_store %arg5[%c0_52, %c0_53, %c1_54, %c0_55], %55 {strides = array<i32>} : memref<1x16x16x4xf32, #tpu.memory_space<vmem>>, vector<1x16x15x4xf32>,
    %c0_56 = arith.constant 0 : index
    %c0_57 = arith.constant 0 : index
    %c0_58 = arith.constant 0 : index
    %c0_59 = arith.constant 0 : index
    %56 = vector.load %arg5[%c0_56, %c0_57, %c0_58, %c0_59] : memref<1x16x16x4xf32, #tpu.memory_space<vmem>>, vector<1x16x15x4xf32>
    %57 = vector.shape_cast %56 : vector<1x16x15x4xf32> to vector<16x15x4xf32>
    %c0_60 = arith.constant 0 : index
    %c0_61 = arith.constant 0 : index
    %c1_62 = arith.constant 1 : index
    %c0_63 = arith.constant 0 : index
    %58 = vector.load %arg4[%c0_60, %c0_61, %c1_62, %c0_63] : memref<1x16x16x4xf32, #tpu.memory_space<vmem>>, vector<1x16x15x4xf32>
    %59 = vector.shape_cast %58 : vector<1x16x15x4xf32> to vector<16x15x4xf32>
    %60 = vector.broadcast %5 : f32 to vector<16x15x4xf32>
    %61 = arith.mulf %60, %59 : vector<16x15x4xf32>
    %62 = arith.addf %57, %61 : vector<16x15x4xf32>
    %c0_64 = arith.constant 0 : index
    %c0_65 = arith.constant 0 : index
    %c0_66 = arith.constant 0 : index
    %c0_67 = arith.constant 0 : index
    %63 = vector.load %arg5[%c0_64, %c0_65, %c0_66, %c0_67] : memref<1x16x16x4xf32, #tpu.memory_space<vmem>>, vector<1x16x15x4xf32>
    %64 = vector.shape_cast %63 : vector<1x16x15x4xf32> to vector<16x15x4xf32>
    %65 = vector.shape_cast %62 : vector<16x15x4xf32> to vector<1x16x15x4xf32>
    tpu.vector_store %arg5[%c0_64, %c0_65, %c0_66, %c0_67], %65 {strides = array<i32>} : memref<1x16x16x4xf32, #tpu.memory_space<vmem>>, vector<1x16x15x4xf32>,
    %c0_68 = arith.constant 0 : index
    %c0_69 = arith.constant 0 : index
    %c1_70 = arith.constant 1 : index
    %c0_71 = arith.constant 0 : index
    %66 = vector.load %arg5[%c0_68, %c0_69, %c1_70, %c0_71] : memref<1x16x16x4xf32, #tpu.memory_space<vmem>>, vector<1x15x15x4xf32>
    %67 = vector.shape_cast %66 : vector<1x15x15x4xf32> to vector<15x15x4xf32>
    %c0_72 = arith.constant 0 : index
    %c1_73 = arith.constant 1 : index
    %c0_74 = arith.constant 0 : index
    %c0_75 = arith.constant 0 : index
    %68 = vector.load %arg4[%c0_72, %c1_73, %c0_74, %c0_75] : memref<1x16x16x4xf32, #tpu.memory_space<vmem>>, vector<1x15x15x4xf32>
    %69 = vector.shape_cast %68 : vector<1x15x15x4xf32> to vector<15x15x4xf32>
    %70 = vector.broadcast %6 : f32 to vector<15x15x4xf32>
    %71 = arith.mulf %70, %69 : vector<15x15x4xf32>
    %72 = arith.addf %67, %71 : vector<15x15x4xf32>
    %c0_76 = arith.constant 0 : index
    %c0_77 = arith.constant 0 : index
    %c1_78 = arith.constant 1 : index
    %c0_79 = arith.constant 0 : index
    %73 = vector.load %arg5[%c0_76, %c0_77, %c1_78, %c0_79] : memref<1x16x16x4xf32, #tpu.memory_space<vmem>>, vector<1x15x15x4xf32>
    %74 = vector.shape_cast %73 : vector<1x15x15x4xf32> to vector<15x15x4xf32>
    %75 = vector.shape_cast %72 : vector<15x15x4xf32> to vector<1x15x15x4xf32>
    tpu.vector_store %arg5[%c0_76, %c0_77, %c1_78, %c0_79], %75 {strides = array<i32>} : memref<1x16x16x4xf32, #tpu.memory_space<vmem>>, vector<1x15x15x4xf32>,
    %c0_80 = arith.constant 0 : index
    %c0_81 = arith.constant 0 : index
    %c0_82 = arith.constant 0 : index
    %c0_83 = arith.constant 0 : index
    %76 = vector.load %arg5[%c0_80, %c0_81, %c0_82, %c0_83] : memref<1x16x16x4xf32, #tpu.memory_space<vmem>>, vector<1x15x16x4xf32>
    %77 = vector.shape_cast %76 : vector<1x15x16x4xf32> to vector<15x16x4xf32>
    %c0_84 = arith.constant 0 : index
    %c1_85 = arith.constant 1 : index
    %c0_86 = arith.constant 0 : index
    %c0_87 = arith.constant 0 : index
    %78 = vector.load %arg4[%c0_84, %c1_85, %c0_86, %c0_87] : memref<1x16x16x4xf32, #tpu.memory_space<vmem>>, vector<1x15x16x4xf32>
    %79 = vector.shape_cast %78 : vector<1x15x16x4xf32> to vector<15x16x4xf32>
    %80 = vector.broadcast %7 : f32 to vector<15x16x4xf32>
    %81 = arith.mulf %80, %79 : vector<15x16x4xf32>
    %82 = arith.addf %77, %81 : vector<15x16x4xf32>
    %c0_88 = arith.constant 0 : index
    %c0_89 = arith.constant 0 : index
    %c0_90 = arith.constant 0 : index
    %c0_91 = arith.constant 0 : index
    %83 = vector.load %arg5[%c0_88, %c0_89, %c0_90, %c0_91] : memref<1x16x16x4xf32, #tpu.memory_space<vmem>>, vector<1x15x16x4xf32>
    %84 = vector.shape_cast %83 : vector<1x15x16x4xf32> to vector<15x16x4xf32>
    %85 = vector.shape_cast %82 : vector<15x16x4xf32> to vector<1x15x16x4xf32>
    tpu.vector_store %arg5[%c0_88, %c0_89, %c0_90, %c0_91], %85 {strides = array<i32>} : memref<1x16x16x4xf32, #tpu.memory_space<vmem>>, vector<1x15x16x4xf32>,
    %c0_92 = arith.constant 0 : index
    %c0_93 = arith.constant 0 : index
    %c0_94 = arith.constant 0 : index
    %c0_95 = arith.constant 0 : index
    %86 = vector.load %arg5[%c0_92, %c0_93, %c0_94, %c0_95] : memref<1x16x16x4xf32, #tpu.memory_space<vmem>>, vector<1x15x15x4xf32>
    %87 = vector.shape_cast %86 : vector<1x15x15x4xf32> to vector<15x15x4xf32>
    %c0_96 = arith.constant 0 : index
    %c1_97 = arith.constant 1 : index
    %c1_98 = arith.constant 1 : index
    %c0_99 = arith.constant 0 : index
    %88 = vector.load %arg4[%c0_96, %c1_97, %c1_98, %c0_99] : memref<1x16x16x4xf32, #tpu.memory_space<vmem>>, vector<1x15x15x4xf32>
    %89 = vector.shape_cast %88 : vector<1x15x15x4xf32> to vector<15x15x4xf32>
    %90 = vector.broadcast %8 : f32 to vector<15x15x4xf32>
    %91 = arith.mulf %90, %89 : vector<15x15x4xf32>
    %92 = arith.addf %87, %91 : vector<15x15x4xf32>
    %c0_100 = arith.constant 0 : index
    %c0_101 = arith.constant 0 : index
    %c0_102 = arith.constant 0 : index
    %c0_103 = arith.constant 0 : index
    %93 = vector.load %arg5[%c0_100, %c0_101, %c0_102, %c0_103] : memref<1x16x16x4xf32, #tpu.memory_space<vmem>>, vector<1x15x15x4xf32>
    %94 = vector.shape_cast %93 : vector<1x15x15x4xf32> to vector<15x15x4xf32>
    %95 = vector.shape_cast %92 : vector<15x15x4xf32> to vector<1x15x15x4xf32>
    tpu.vector_store %arg5[%c0_100, %c0_101, %c0_102, %c0_103], %95 {strides = array<i32>} : memref<1x16x16x4xf32, #tpu.memory_space<vmem>>, vector<1x15x15x4xf32>,
    return
  }
  func.func @transform_0(%arg0: i32, %arg1: i32, %arg2: i32) -> i32 {
    %c0_i32 = arith.constant 0 : i32
    %c0_i32_0 = arith.constant 0 : i32
    return %c0_i32 : i32
  }
  func.func @transform_1(%arg0: i32, %arg1: i32, %arg2: i32) -> (i32, i32, i32, i32) {
    %c0_i32 = arith.constant 0 : i32
    %c0_i32_0 = arith.constant 0 : i32
    return %arg0, %arg2, %c0_i32, %arg1 : i32, i32, i32, i32
  }
  func.func @transform_2(%arg0: i32, %arg1: i32, %arg2: i32) -> (i32, i32, i32, i32) {
    %c0_i32 = arith.constant 0 : i32
    %c0_i32_0 = arith.constant 0 : i32
    return %arg0, %arg2, %c0_i32, %arg1 : i32, i32, i32, i32
  }
}

</mosaic_0001>

<bundles_post_ra>
// kernel: tpu_custom_call.1
= control target key start
LH: loop header
LB: loop body
LE: loop exit
PB: predicated region body
PF: predicated region fallthrough
CT: control target
= control target key end

     0   :  { %7 = vsyncpa [#allocation3], 0  ;;  %s2077_s9 = smov 0   ;;  %s2079_s10 = smov 0   ;;  %s3688_s0 = inlined_call_operand.vmem [shape: f32[9], index: 0, kind: input, shape index: {}]   ;;  %s3689_s1 = inlined_call_operand.vmem [shape: f32[2,16,16,4], index: 1, kind: input, shape index: {}]   ;;  %s3690_s2 = inlined_call_operand.vmem [shape: f32[2,16,16,4], index: 2, kind: output, shape index: {}]  }
   0x1   :  { %s2081_s11 = smov 0  }
   0x2 LB: > { %s1690_s12 = sadd.s32 4294967295, %s2059_s11   ;;  %s32_s13 = sadd.s32 1, %s2055_s10  ;;  %s2059_s11 = sphi %s2081_s11, %s13_s11   ;;  %s2055_s10 = sphi %s2079_s10, %s3692_s10   ;;  %s2051_s9 = sphi %s2077_s9, %s3691_s9  }
   0x3   : > { %p34_p0 = scmp.ge.s32.totalorder %s32_s13, 2  ;;  %p1692_p1 = scmp.ge.s32.totalorder %s2059_s11, 1 }
   0x4   : > { %p118_p2 = scmp.lt.s32.totalorder %s2059_s11, 3  ;;  %p1991_p4 = scmp.eq.s32.totalorder %s1690_s12, 0 }
   0x5   : > { %s3694_s13 = smov (%p34_p0, %s32_s13), 0  ;;  %s130_s16 = sshll.u32 %s3688_s0, 4  ;;  %s131_s16 = int_to_ptr.vmem [resolvable:$true] %s130_s16 }
   0x6   : > { %p119_p3 = pnand %p1692_p1, %p118_p2  ;;  %s2061_s17 = smov [#allocation2]  }
   0x8   : > { %p1987_p5 = pneg %p119_p3  ;;  %160 = sbr.rel (%p119_p3) target bundleno = 301 (0x12d), region = 28 }
   0xa   : > { %p1988_p6 = pnand %p1991_p4, %p1987_p5 }
   0xc   : > { %1990 = dma.vmem_to_smem (!%p1988_p6), %s131_s16, 16, %s2061_s17, [#allocation3]  }
   0xd   : > { %2046 = dma.done.wait (%p1991_p4), [#allocation3], 16  }
   0xe   : > { %2048 = vsyncadd (%p1991_p4), [#allocation3], 4294967280 }
   0xf   : > { %167 = sfence }
  0x10   : > { %p201_p7 = scmp.lt.s32.totalorder %s2051_s9, 1  ;;  %s1704_s18 = sld [smem:[#allocation2 + $0x4]]  ;;  %vm302_vm0 = vcmask 31744   ;;  %vm458_vm1 = vcmask 30720  }
  0x11   : > { %s228_s26 = sld [smem:[#allocation2]] }
  0x12   : > { %s3696_s9 = smov (!%p201_p7, %s2051_s9), 1  ;;  %s2415_s27 = sld [smem:[#allocation2 + $0x1]] }
  0x13   : > { %s1981_s19 = sshll.u32 %s3696_s9, 8  ;;  %s2559_s28 = sld [smem:[#allocation2 + $0x3]] }
  0x14   : > { %s2102_s22 = scalar_lea.vmem %s3689_s1, %s1981_s19  ;;  %s2107_s25 = scalar_lea.vmem %s3690_s2, %s1981_s19 }
  0x15   : > { %v2110_v0 = vld [vmem:[%s2102_s22 + $0x10] sm:$0xff]  ;;  %v2115_v2 = vld [vmem:[%s2102_s22 + $0x18] sm:$0xff]  ;;  %v2118_v3 = vld [vmem:[%s2102_s22 + $0x20] sm:$0xff]  ;;  %s2581_s29 = sld [smem:[#allocation2 + $0x2]] }
  0x16   : > { %v2112_v1 = vstv %s1704_s18  ;;  %v2127_v7 = vld [vmem:[%s2102_s22 + $0x28] sm:$0xff]  ;;  %v2130_v8 = vld [vmem:[%s2102_s22 + $0x30] sm:$0xff]  ;;  %v2133_v9 = vld [vmem:[%s2102_s22 + $0x38] sm:$0xff]  ;;  %s2763_s30 = sld [smem:[#allocation2 + $0x5]] }
  0x17   : > { %v272_v4 = vmul.f32 %v2112_v1, %v2110_v0  ;;  %v273_v5 = vmul.f32 %v2112_v1, %v2115_v2  ;;  %v274_v6 = vmul.f32 %v2112_v1, %v2118_v3  ;;  %v275_v10 = vmul.f32 %v2112_v1, %v2127_v7  ;;  %v2138_v11 = vld [vmem:[%s2102_s22 + $0x40] sm:$0xff]  ;;  %v2145_v13 = vld [vmem:[%s2102_s22 + $0x48] sm:$0xff]  ;;  %v2152_v15 = vld [vmem:[%s2102_s22 + $0x50] sm:$0xff]  ;;  %s2973_s3 = sld [smem:[#allocation2 + $0x6]] }
  0x18   : > { %v276_v12 = vmul.f32 %v2112_v1, %v2130_v8  ;;  %v277_v14 = vmul.f32 %v2112_v1, %v2133_v9  ;;  %v278_v16 = vmul.f32 %v2112_v1, %v2138_v11  ;;  %v2159_v17 = vld [vmem:[%s2102_s22 + $0x58] sm:$0xff]  ;;  %v279_v18 = vmul.f32 %v2112_v1, %v2145_v13  ;;  %v2166_v19 = vld [vmem:[%s2102_s22 + $0x60] sm:$0xff]  ;;  %v2173_v21 = vld [vmem:[%s2102_s22 + $0x68] sm:$0xff]  ;;  %s3140_s4 = sld [smem:[#allocation2 + $0x7]] }
  0x19   : > { %305 = vst.msk [vmem:[%s2107_s25 + $0x10] sm:$0xff] %vm302_vm0, %v272_v4  ;;  %v280_v20 = vmul.f32 %v2112_v1, %v2152_v15  ;;  %v281_v22 = vmul.f32 %v2112_v1, %v2159_v17  ;;  %v2180_v23 = vld [vmem:[%s2102_s22 + $0x70] sm:$0xff]  ;;  %v282_v24 = vmul.f32 %v2112_v1, %v2166_v19  ;;  %v2187_v25 = vld [vmem:[%s2102_s22 + $0x78] sm:$0xff]  ;;  %v283_v26 = vmul.f32 %v2112_v1, %v2173_v21  ;;  %v2194_v27 = vld [vmem:[%s2102_s22 + $0x80] sm:$0xff]  ;;  %s3308_s5 = sld [smem:[#allocation2 + $0x8]] }
  0x1a   : > { %306 = vst.msk [vmem:[%s2107_s25 + $0x18] sm:$0xff] %vm302_vm0, %v273_v5  ;;  %v284_v28 = vmul.f32 %v2112_v1, %v2180_v23  ;;  %v2201_v29 = vld [vmem:[%s2102_s22 + $0x88] sm:$0xff]  ;;  %v285_v30 = vmul.f32 %v2112_v1, %v2187_v25  ;;  %v2208_v31 = vld [vmem:[%s2102_s22 + $0x90] sm:$0xff]  ;;  %v286_v32 = vmul.f32 %v2112_v1, %v2194_v27  ;;  %v2215_v33 = vld [vmem:[%s2102_s22 + $0x98] sm:$0xff] }
  0x1b   : > { %307 = vst.msk [vmem:[%s2107_s25 + $0x20] sm:$0xff] %vm302_vm0, %v274_v6  ;;  %v287_v34 = vmul.f32 %v2112_v1, %v2201_v29  ;;  %v2222_v35 = vld [vmem:[%s2102_s22 + $0xa0] sm:$0xff]  ;;  %v288_v36 = vmul.f32 %v2112_v1, %v2208_v31  ;;  %v2229_v37 = vld [vmem:[%s2102_s22 + $0xa8] sm:$0xff]  ;;  %v289_v38 = vmul.f32 %v2112_v1, %v2215_v33  ;;  %v2236_v39 = vld [vmem:[%s2102_s22 + $0xb0] sm:$0xff] }
  0x1c   : > { %308 = vst.msk [vmem:[%s2107_s25 + $0x28] sm:$0xff] %vm302_vm0, %v275_v10  ;;  %v290_v40 = vmul.f32 %v2112_v1, %v2222_v35  ;;  %v2243_v41 = vld [vmem:[%s2102_s22 + $0xb8] sm:$0xff]  ;;  %v291_v42 = vmul.f32 %v2112_v1, %v2229_v37  ;;  %v2250_v43 = vld [vmem:[%s2102_s22 + $0xc0] sm:$0xff]  ;;  %v292_v44 = vmul.f32 %v2112_v1, %v2236_v39  ;;  %v2257_v45 = vld [vmem:[%s2102_s22 + $0xc8] sm:$0xff] }
  0x1d   : > { %309 = vst.msk [vmem:[%s2107_s25 + $0x30] sm:$0xff] %vm302_vm0, %v276_v12  ;;  %v293_v46 = vmul.f32 %v2112_v1, %v2243_v41  ;;  %v2264_v47 = vld [vmem:[%s2102_s22 + $0xd0] sm:$0xff]  ;;  %v294_v48 = vmul.f32 %v2112_v1, %v2250_v43  ;;  %v2271_v49 = vld [vmem:[%s2102_s22 + $0xd8] sm:$0xff]  ;;  %v295_v50 = vmul.f32 %v2112_v1, %v2257_v45  ;;  %v2278_v51 = vld [vmem:[%s2102_s22 + $0xe0] sm:$0xff] }
  0x1e   : > { %310 = vst.msk [vmem:[%s2107_s25 + $0x38] sm:$0xff] %vm302_vm0, %v277_v14  ;;  %v296_v52 = vmul.f32 %v2112_v1, %v2264_v47  ;;  %v2285_v53 = vld [vmem:[%s2102_s22 + $0xe8] sm:$0xff]  ;;  %v297_v54 = vmul.f32 %v2112_v1, %v2271_v49  ;;  %v2292_v55 = vld [vmem:[%s2102_s22] sm:$0xff]  ;;  %v2294_v56 = vstv %s228_s26  ;;  %v298_v57 = vmul.f32 %v2112_v1, %v2278_v51 }
  0x1f   : > { %311 = vst.msk [vmem:[%s2107_s25 + $0x40] sm:$0xff] %vm302_vm0, %v278_v16  ;;  %v2301_v58 = vld [vmem:[%s2102_s22 + $0x8] sm:$0xff]  ;;  %v299_v60 = vmul.f32 %v2112_v1, %v2285_v53  ;;  %v267_v61 = vld [vmem:[%s2102_s22 + $0xf0] sm:$0xff]  ;;  %v270_v62 = vmul.f32 %v2112_v1, %v2292_v55  ;;  %v268_v63 = vld [vmem:[%s2102_s22 + $0xf8] sm:$0xff]  ;;  %v397_v4 = vmul.f32 %v2294_v56, %v2292_v55 }
  0x20   : > { %312 = vst.msk [vmem:[%s2107_s25 + $0x48] sm:$0xff] %vm302_vm0, %v279_v18  ;;  %v367_v59 = vld [vmem:[%s2102_s22 + $0x8] sm:$0x7f]  ;;  %v369_v5 = vld [vmem:[%s2102_s22 + $0x18] sm:$0x7f]  ;;  %v271_v6 = vmul.f32 %v2112_v1, %v2301_v58  ;;  %v300_v14 = vmul.f32 %v2112_v1, %v267_v61  ;;  %v399_v18 = vmul.f32 %v2294_v56, %v2110_v0 }
  0x21   : > { %313 = vst.msk [vmem:[%s2107_s25 + $0x50] sm:$0xff] %vm302_vm0, %v280_v20  ;;  %v1709_v10 = vld [vmem:[%s2107_s25 + $0x11] sm:$0xff]  ;;  %v398_v12 = vmul.f32 %v2294_v56, %v367_v59  ;;  %v1710_v16 = vld [vmem:[%s2107_s25 + $0x19] sm:$0x7f]  ;;  %v371_v20 = vld [vmem:[%s2102_s22 + $0x28] sm:$0x7f]  ;;  %v405_v59 = vmul.f32 %v2294_v56, %v2138_v11 }
  0x22   : > { %314 = vst.msk [vmem:[%s2107_s25 + $0x58] sm:$0xff] %vm302_vm0, %v281_v22  ;;  %v301_v22 = vmul.f32 %v2112_v1, %v268_v63 }
  0x23   : > { %315 = vst.msk [vmem:[%s2107_s25 + $0x60] sm:$0xff] %vm302_vm0, %v282_v24  ;;  %v1711_v24 = vld [vmem:[%s2107_s25 + $0x21] sm:$0xff] }
  0x24   : > { %316 = vst.msk [vmem:[%s2107_s25 + $0x68] sm:$0xff] %vm302_vm0, %v283_v26  ;;  %v400_v26 = vmul.f32 %v2294_v56, %v369_v5 }
  0x25   : > { %317 = vst.msk [vmem:[%s2107_s25 + $0x70] sm:$0xff] %vm302_vm0, %v284_v28  ;;  %v427_v28 = vadd.f32 %v1709_v10, %v397_v4  ;;  %v1713_v1 = vld [vmem:[%s2107_s25 + $0x31] sm:$0xff]  ;;  %v379_v10 = vld [vmem:[%s2102_s22 + $0x68] sm:$0x7f] }
  0x26   : > { %318 = vst.msk [vmem:[%s2107_s25 + $0x78] sm:$0xff] %vm302_vm0, %v285_v30  ;;  %v1712_v30 = vld [vmem:[%s2107_s25 + $0x29] sm:$0x7f] }
  0x27   : > { %319 = vst.msk [vmem:[%s2107_s25 + $0x80] sm:$0xff] %vm302_vm0, %v286_v32  ;;  %v401_v32 = vmul.f32 %v2294_v56, %v2118_v3 }
  0x28   : > { %320 = vst.msk [vmem:[%s2107_s25 + $0x88] sm:$0xff] %vm302_vm0, %v287_v34  ;;  %v373_v34 = vld [vmem:[%s2102_s22 + $0x38] sm:$0x7f] }
  0x29   : > { %321 = vst.msk [vmem:[%s2107_s25 + $0x90] sm:$0xff] %vm302_vm0, %v288_v36  ;;  %v428_v36 = vadd.f32 %v1710_v16, %v398_v12  ;;  %v1718_v5 = vld [vmem:[%s2107_s25 + $0x59] sm:$0x7f] }
  0x2a   : > { %322 = vst.msk [vmem:[%s2107_s25 + $0x98] sm:$0xff] %vm302_vm0, %v289_v38  ;;  %v402_v38 = vmul.f32 %v2294_v56, %v371_v20 }
  0x2b   : > { %323 = vst.msk [vmem:[%s2107_s25 + $0xa0] sm:$0xff] %vm302_vm0, %v290_v40  ;;  %v429_v40 = vadd.f32 %v1711_v24, %v399_v18  ;;  %v1720_v20 = vld [vmem:[%s2107_s25 + $0x69] sm:$0x7f]  ;;  %v381_v24 = vld [vmem:[%s2102_s22 + $0x78] sm:$0x7f] }
  0x2c   : > { %324 = vst.msk [vmem:[%s2107_s25 + $0xa8] sm:$0xff] %vm302_vm0, %v291_v42  ;;  %v1714_v42 = vld [vmem:[%s2107_s25 + $0x39] sm:$0x7f] }
  0x2d   : > { %325 = vst.msk [vmem:[%s2107_s25 + $0xb0] sm:$0xff] %vm302_vm0, %v292_v44  ;;  %v403_v44 = vmul.f32 %v2294_v56, %v2130_v8  ;;  %v432_v61 = vadd.f32 %v1714_v42, %v402_v38  ;;  %v412_v42 = vmul.f32 %v2294_v56, %v381_v24 }
  0x2e   : > { %326 = vst.msk [vmem:[%s2107_s25 + $0xb8] sm:$0xff] %vm302_vm0, %v293_v46  ;;  %v375_v46 = vld [vmem:[%s2102_s22 + $0x48] sm:$0x7f] }
  0x2f   : > { %327 = vst.msk [vmem:[%s2107_s25 + $0xc0] sm:$0xff] %vm302_vm0, %v294_v48  ;;  %v430_v48 = vadd.f32 %v1712_v30, %v400_v26  ;;  %v406_v63 = vmul.f32 %v2294_v56, %v375_v46  ;;  %v410_v30 = vmul.f32 %v2294_v56, %v379_v10  ;;  %v1724_v46 = vld [vmem:[%s2107_s25 + $0x89] sm:$0x7f] }
  0x30   : > { %328 = vst.msk [vmem:[%s2107_s25 + $0xc8] sm:$0xff] %vm302_vm0, %v295_v50  ;;  %v1715_v50 = vld [vmem:[%s2107_s25 + $0x41] sm:$0xff] }
  0x31   : > { %329 = vst.msk [vmem:[%s2107_s25 + $0xd0] sm:$0xff] %vm302_vm0, %v296_v52  ;;  %v404_v52 = vmul.f32 %v2294_v56, %v373_v34  ;;  %v433_v4 = vadd.f32 %v1715_v50, %v403_v44  ;;  %v436_v26 = vadd.f32 %v1718_v5, %v406_v63  ;;  %v1722_v34 = vld [vmem:[%s2107_s25 + $0x79] sm:$0x7f]  ;;  %v442_v63 = vadd.f32 %v1724_v46, %v412_v42 }
  0x32   : > { %330 = vst.msk [vmem:[%s2107_s25 + $0xd8] sm:$0xff] %vm302_vm0, %v297_v54  ;;  %v431_v54 = vadd.f32 %v1713_v1, %v401_v32  ;;  %v383_v1 = vld [vmem:[%s2102_s22 + $0x88] sm:$0x7f]  ;;  %v385_v50 = vld [vmem:[%s2102_s22 + $0x98] sm:$0x7f] }
  0x33   : > { %331 = vst.msk [vmem:[%s2107_s25 + $0xe0] sm:$0xff] %vm302_vm0, %v298_v57  ;;  %v1716_v57 = vld [vmem:[%s2107_s25 + $0x49] sm:$0x7f]  ;;  %v416_v5 = vmul.f32 %v2294_v56, %v385_v50 }
  0x34   : > { %332 = vst.msk [vmem:[%s2107_s25 + $0xe8] sm:$0xff] %vm302_vm0, %v299_v60  ;;  %v377_v60 = vld [vmem:[%s2102_s22 + $0x58] sm:$0x7f]  ;;  %v434_v12 = vadd.f32 %v1716_v57, %v404_v52  ;;  %v440_v52 = vadd.f32 %v1722_v34, %v410_v30  ;;  %v414_v57 = vmul.f32 %v2294_v56, %v383_v1  ;;  %v1728_v10 = vld [vmem:[%s2107_s25 + $0xa9] sm:$0x7f] }
  0x35   : > { %303 = vst.msk [vmem:[%s2107_s25] sm:$0xff] %vm302_vm0, %v270_v62  ;;  %v1717_v62 = vld [vmem:[%s2107_s25 + $0x51] sm:$0xff]  ;;  %v408_v16 = vmul.f32 %v2294_v56, %v377_v60  ;;  %v1726_v60 = vld [vmem:[%s2107_s25 + $0x99] sm:$0x7f]  ;;  %v446_v30 = vadd.f32 %v1728_v10, %v416_v5 }
  0x36   : > { %304 = vst.msk [vmem:[%s2107_s25 + $0x8] sm:$0xff] %vm302_vm0, %v271_v6  ;;  %v407_v6 = vmul.f32 %v2294_v56, %v2152_v15  ;;  %v435_v18 = vadd.f32 %v1717_v62, %v405_v59  ;;  %v387_v62 = vld [vmem:[%s2102_s22 + $0xa8] sm:$0x7f]  ;;  %v1730_v24 = vld [vmem:[%s2107_s25 + $0xb9] sm:$0x7f] }
  0x37   : > { %333 = vst.msk [vmem:[%s2107_s25 + $0xf0] sm:$0xff] %vm302_vm0, %v300_v14  ;;  %v1719_v14 = vld [vmem:[%s2107_s25 + $0x61] sm:$0xff]  ;;  %v438_v38 = vadd.f32 %v1720_v20, %v408_v16  ;;  %v444_v16 = vadd.f32 %v1726_v60, %v414_v57  ;;  %v418_v20 = vmul.f32 %v2294_v56, %v387_v62  ;;  %v1732_v1 = vld [vmem:[%s2107_s25 + $0xc9] sm:$0x7f] }
  0x38   : > { %334 = vst.msk [vmem:[%s2107_s25 + $0xf8] sm:$0xff] %vm302_vm0, %v301_v22  ;;  %v409_v22 = vmul.f32 %v2294_v56, %v2166_v19  ;;  %v437_v32 = vadd.f32 %v1719_v14, %v407_v6  ;;  %v389_v14 = vld [vmem:[%s2102_s22 + $0xb8] sm:$0x7f] }
  0x39   : > { %1739 = vst.msk [vmem:[%s2107_s25 + $0x11] sm:$0xff] %vm302_vm0, %v427_v28  ;;  %v1721_v28 = vld [vmem:[%s2107_s25 + $0x71] sm:$0xff]  ;;  %v420_v34 = vmul.f32 %v2294_v56, %v389_v14  ;;  %v448_v42 = vadd.f32 %v1730_v24, %v418_v20  ;;  %v1734_v50 = vld [vmem:[%s2107_s25 + $0xd9] sm:$0x7f] }
  0x3a   : > { %1740 = vst.msk [vmem:[%s2107_s25 + $0x19] sm:$0x7f] %vm458_vm1, %v428_v36  ;;  %v411_v36 = vmul.f32 %v2294_v56, %v2180_v23  ;;  %v439_v44 = vadd.f32 %v1721_v28, %v409_v22  ;;  %v391_v28 = vld [vmem:[%s2102_s22 + $0xc8] sm:$0x7f] }
  0x3b   : > { %1741 = vst.msk [vmem:[%s2107_s25 + $0x21] sm:$0xff] %vm302_vm0, %v429_v40  ;;  %v1723_v40 = vld [vmem:[%s2107_s25 + $0x81] sm:$0xff]  ;;  %v422_v46 = vmul.f32 %v2294_v56, %v391_v28  ;;  %v450_v57 = vadd.f32 %v1732_v1, %v420_v34 }
  0x3c   : > { %1742 = vst.msk [vmem:[%s2107_s25 + $0x29] sm:$0x7f] %vm458_vm1, %v430_v48  ;;  %v413_v48 = vmul.f32 %v2294_v56, %v2194_v27  ;;  %v441_v59 = vadd.f32 %v1723_v40, %v411_v36  ;;  %v393_v40 = vld [vmem:[%s2102_s22 + $0xd8] sm:$0x7f] }
  0x3d   : > { %1743 = vst.msk [vmem:[%s2107_s25 + $0x31] sm:$0xff] %vm302_vm0, %v431_v54  ;;  %v1725_v54 = vld [vmem:[%s2107_s25 + $0x91] sm:$0xff]  ;;  %v424_v60 = vmul.f32 %v2294_v56, %v393_v40  ;;  %v452_v5 = vadd.f32 %v1734_v50, %v422_v46 }
  0x3e   : > { %1744 = vst.msk [vmem:[%s2107_s25 + $0x39] sm:$0x7f] %vm458_vm1, %v432_v61  ;;  %v415_v61 = vmul.f32 %v2294_v56, %v2208_v31  ;;  %v443_v6 = vadd.f32 %v1725_v54, %v413_v48  ;;  %v395_v54 = vld [vmem:[%s2102_s22 + $0xe8] sm:$0x7f] }
  0x3f   : > { %1745 = vst.msk [vmem:[%s2107_s25 + $0x41] sm:$0xff] %vm302_vm0, %v433_v4  ;;  %v1727_v4 = vld [vmem:[%s2107_s25 + $0xa1] sm:$0xff]  ;;  %v426_v10 = vmul.f32 %v2294_v56, %v395_v54  ;;  %v1738_v14 = vld [vmem:[%s2107_s25 + $0xf9] sm:$0x7f] }
  0x40   : > { %1746 = vst.msk [vmem:[%s2107_s25 + $0x49] sm:$0x7f] %vm458_vm1, %v434_v12  ;;  %v417_v12 = vmul.f32 %v2294_v56, %v2222_v35  ;;  %v445_v22 = vadd.f32 %v1727_v4, %v415_v61  ;;  %v2458_v61 = vstv %s2415_s27  ;;  %v425_v4 = vmul.f32 %v2294_v56, %v2278_v51  ;;  %v1769_v20 = vld [vmem:[%s2107_s25 + $0x10] sm:$0xff] }
  0x41   : > { %1747 = vst.msk [vmem:[%s2107_s25 + $0x51] sm:$0xff] %vm302_vm0, %v435_v18  ;;  %v1729_v18 = vld [vmem:[%s2107_s25 + $0xb1] sm:$0xff]  ;;  %v456_v28 = vadd.f32 %v1738_v14, %v426_v10  ;;  %v556_v46 = vmul.f32 %v2458_v61, %v2133_v9  ;;  %v557_v50 = vmul.f32 %v2458_v61, %v2138_v11  ;;  %v558_v54 = vmul.f32 %v2458_v61, %v2145_v13 }
  0x42   : > { %1748 = vst.msk [vmem:[%s2107_s25 + $0x59] sm:$0x7f] %vm458_vm1, %v436_v26  ;;  %v419_v26 = vmul.f32 %v2294_v56, %v2236_v39  ;;  %v447_v36 = vadd.f32 %v1729_v18, %v417_v12  ;;  %v1770_v24 = vld [vmem:[%s2107_s25 + $0x18] sm:$0xff] }
  0x43   : > { %1749 = vst.msk [vmem:[%s2107_s25 + $0x61] sm:$0xff] %vm302_vm0, %v437_v32  ;;  %v1731_v32 = vld [vmem:[%s2107_s25 + $0xc1] sm:$0xff] }
  0x44   : > { %1750 = vst.msk [vmem:[%s2107_s25 + $0x69] sm:$0x7f] %vm458_vm1, %v438_v38  ;;  %v421_v38 = vmul.f32 %v2294_v56, %v2250_v43  ;;  %v449_v48 = vadd.f32 %v1731_v32, %v419_v26  ;;  %v551_v26 = vmul.f32 %v2458_v61, %v2110_v0  ;;  %v552_v32 = vmul.f32 %v2458_v61, %v2115_v2  ;;  %v1772_v34 = vld [vmem:[%s2107_s25 + $0x28] sm:$0xff]  ;;  %v1773_v1 = vld [vmem:[%s2107_s25 + $0x30] sm:$0xff] }
  0x45   : > { %1751 = vst.msk [vmem:[%s2107_s25 + $0x71] sm:$0xff] %vm302_vm0, %v439_v44  ;;  %v1733_v44 = vld [vmem:[%s2107_s25 + $0xd1] sm:$0xff] }
  0x46   : > { %1752 = vst.msk [vmem:[%s2107_s25 + $0x79] sm:$0x7f] %vm458_vm1, %v440_v52  ;;  %v423_v52 = vmul.f32 %v2294_v56, %v2264_v47  ;;  %v451_v62 = vadd.f32 %v1733_v44, %v421_v38  ;;  %v554_v38 = vmul.f32 %v2458_v61, %v2127_v7  ;;  %v1774_v40 = vld [vmem:[%s2107_s25 + $0x38] sm:$0xff]  ;;  %v1775_v44 = vld [vmem:[%s2107_s25 + $0x40] sm:$0xff] }
  0x47   : > { %1753 = vst.msk [vmem:[%s2107_s25 + $0x81] sm:$0xff] %vm302_vm0, %v441_v59  ;;  %v1735_v59 = vld [vmem:[%s2107_s25 + $0xe1] sm:$0xff] }
  0x48   : > { %1754 = vst.msk [vmem:[%s2107_s25 + $0x89] sm:$0x7f] %vm458_vm1, %v442_v63  ;;  %v1736_v63 = vld [vmem:[%s2107_s25 + $0xe9] sm:$0x7f]  ;;  %v453_v12 = vadd.f32 %v1735_v59, %v423_v52  ;;  %v1777_v52 = vld [vmem:[%s2107_s25 + $0x50] sm:$0xff]  ;;  %v559_v59 = vmul.f32 %v2458_v61, %v2152_v15 }
  0x49   : > { %1755 = vst.msk [vmem:[%s2107_s25 + $0x91] sm:$0xff] %vm302_vm0, %v443_v6  ;;  %v1737_v6 = vld [vmem:[%s2107_s25 + $0xf1] sm:$0xff]  ;;  %v454_v18 = vadd.f32 %v1736_v63, %v424_v60  ;;  %v587_v13 = vadd.f32 %v1777_v52, %v557_v50 }
  0x4a   : > { %1756 = vst.msk [vmem:[%s2107_s25 + $0x99] sm:$0x7f] %vm458_vm1, %v444_v16  ;;  %v549_v16 = vmul.f32 %v2458_v61, %v2292_v55  ;;  %v455_v56 = vadd.f32 %v1737_v6, %v425_v4  ;;  %v1779_v60 = vld [vmem:[%s2107_s25 + $0x60] sm:$0xff]  ;;  %v561_v4 = vmul.f32 %v2458_v61, %v2166_v19  ;;  %v562_v6 = vmul.f32 %v2458_v61, %v2173_v21 }
  0x4b   : > { %1757 = vst.msk [vmem:[%s2107_s25 + $0xa1] sm:$0xff] %vm302_vm0, %v445_v22  ;;  %v550_v22 = vmul.f32 %v2458_v61, %v2301_v58  ;;  %v1780_v63 = vld [vmem:[%s2107_s25 + $0x68] sm:$0xff] }
  0x4c   : > { %1758 = vst.msk [vmem:[%s2107_s25 + $0xa9] sm:$0x7f] %vm458_vm1, %v446_v30  ;;  %v1771_v30 = vld [vmem:[%s2107_s25 + $0x20] sm:$0xff]  ;;  %v579_v58 = vadd.f32 %v1769_v20, %v549_v16  ;;  %v564_v16 = vmul.f32 %v2458_v61, %v2187_v25  ;;  %v565_v20 = vmul.f32 %v2458_v61, %v2194_v27  ;;  %v567_v27 = vmul.f32 %v2458_v61, %v2208_v31 }
  0x4d   : > { %1759 = vst.msk [vmem:[%s2107_s25 + $0xb1] sm:$0xff] %vm302_vm0, %v447_v36  ;;  %v553_v36 = vmul.f32 %v2458_v61, %v2118_v3  ;;  %v580_v0 = vadd.f32 %v1770_v24, %v550_v22  ;;  %v581_v2 = vadd.f32 %v1771_v30, %v551_v26  ;;  %v582_v3 = vadd.f32 %v1772_v34, %v552_v32  ;;  %v1782_v10 = vld [vmem:[%s2107_s25 + $0x78] sm:$0xff] }
  0x4e   : > { %1760 = vst.msk [vmem:[%s2107_s25 + $0xb9] sm:$0x7f] %vm458_vm1, %v448_v42  ;;  %v555_v42 = vmul.f32 %v2458_v61, %v2130_v8  ;;  %v584_v8 = vadd.f32 %v1774_v40, %v554_v38  ;;  %v1783_v14 = vld [vmem:[%s2107_s25 + $0x80] sm:$0xff] }
  0x4f   : > { %1761 = vst.msk [vmem:[%s2107_s25 + $0xc1] sm:$0xff] %vm302_vm0, %v449_v48  ;;  %v583_v7 = vadd.f32 %v1773_v1, %v553_v36  ;;  %v1776_v48 = vld [vmem:[%s2107_s25 + $0x48] sm:$0xff]  ;;  %v570_v36 = vmul.f32 %v2458_v61, %v2229_v37  ;;  %v572_v37 = vmul.f32 %v2458_v61, %v2243_v41 }
  0x50   : > { %1762 = vst.msk [vmem:[%s2107_s25 + $0xc9] sm:$0x7f] %vm458_vm1, %v450_v57  ;;  %v585_v9 = vadd.f32 %v1775_v44, %v555_v42  ;;  %v1778_v57 = vld [vmem:[%s2107_s25 + $0x58] sm:$0xff]  ;;  %v586_v11 = vadd.f32 %v1776_v48, %v556_v46  ;;  %v1785_v22 = vld [vmem:[%s2107_s25 + $0x90] sm:$0xff]  ;;  %v573_v42 = vmul.f32 %v2458_v61, %v2250_v43  ;;  %v574_v44 = vmul.f32 %v2458_v61, %v2257_v45  ;;  %v823_v48 = vld [vmem:[%s2102_s22 + $0x8] sm:$0x7f] }
  0x51   : > { %1763 = vst.msk [vmem:[%s2107_s25 + $0xd1] sm:$0xff] %vm302_vm0, %v451_v62  ;;  %v560_v62 = vmul.f32 %v2458_v61, %v2159_v17  ;;  %v588_v15 = vadd.f32 %v1778_v57, %v558_v54  ;;  %v589_v17 = vadd.f32 %v1779_v60, %v559_v59  ;;  %v1786_v24 = vld [vmem:[%s2107_s25 + $0x98] sm:$0xff]  ;;  %v595_v30 = vadd.f32 %v1785_v22, %v565_v20  ;;  %v790_v57 = vld [vmem:[%s2107_s25 + $0x1] sm:$0xff] }
  0x52   : > { %1764 = vst.msk [vmem:[%s2107_s25 + $0xd9] sm:$0x7f] %vm458_vm1, %v452_v5  ;;  %v1781_v5 = vld [vmem:[%s2107_s25 + $0x70] sm:$0xff]  ;;  %v2604_v46 = vstv %s2559_s28  ;;  %v575_v43 = vmul.f32 %v2458_v61, %v2264_v47  ;;  %v576_v45 = vmul.f32 %v2458_v61, %v2271_v49  ;;  %v2630_v49 = vstv %s2581_s29 }
  0x53   : > { %1765 = vst.msk [vmem:[%s2107_s25 + $0xe1] sm:$0xff] %vm302_vm0, %v453_v12  ;;  %v563_v12 = vmul.f32 %v2458_v61, %v2180_v23  ;;  %v590_v19 = vadd.f32 %v1780_v63, %v560_v62  ;;  %v591_v21 = vadd.f32 %v1781_v5, %v561_v4  ;;  %v592_v23 = vadd.f32 %v1782_v10, %v562_v6  ;;  %v1788_v32 = vld [vmem:[%s2107_s25 + $0xa8] sm:$0xff]  ;;  %v2644_v5 = vld [vmem:[%s2102_s22 + $0x11] sm:$0xff]  ;;  %v672_v10 = vld [vmem:[%s2102_s22 + $0x19] sm:$0x7f] }
  0x54   : > { %1766 = vst.msk [vmem:[%s2107_s25 + $0xe9] sm:$0x7f] %vm458_vm1, %v454_v18  ;;  %v1784_v18 = vld [vmem:[%s2107_s25 + $0x88] sm:$0xff]  ;;  %v1789_v34 = vld [vmem:[%s2107_s25 + $0xb0] sm:$0xff]  ;;  %v855_v47 = vmul.f32 %v2604_v46, %v2292_v55  ;;  %v856_v59 = vmul.f32 %v2604_v46, %v823_v48  ;;  %v577_v62 = vmul.f32 %v2458_v61, %v2278_v51  ;;  %v703_v22 = vmul.f32 %v2630_v49, %v672_v10 }
  0x55   : > { %1767 = vst.msk [vmem:[%s2107_s25 + $0xf1] sm:$0xff] %vm302_vm0, %v455_v56  ;;  %v566_v56 = vmul.f32 %v2458_v61, %v2201_v29  ;;  %v593_v25 = vadd.f32 %v1783_v14, %v563_v12  ;;  %v594_v26 = vadd.f32 %v1784_v18, %v564_v16  ;;  %v568_v29 = vmul.f32 %v2458_v61, %v2215_v33  ;;  %v791_v55 = vld [vmem:[%s2107_s25 + $0x9] sm:$0x7f]  ;;  %v2748_v10 = vld [vmem:[%s2102_s22 + $0x91] sm:$0xff] }
  0x56   : > { %1768 = vst.msk [vmem:[%s2107_s25 + $0xf9] sm:$0x7f] %vm458_vm1, %v456_v28  ;;  %v1787_v28 = vld [vmem:[%s2107_s25 + $0xa0] sm:$0xff]  ;;  %v887_v6 = vadd.f32 %v855_v47, %v790_v57  ;;  %v888_v12 = vadd.f32 %v856_v59, %v791_v55  ;;  %v674_v18 = vld [vmem:[%s2102_s22 + $0x29] sm:$0x7f] }
  0x57   : > { %1799 = vst.msk [vmem:[%s2107_s25 + $0x10] sm:$0xff] %vm302_vm0, %v579_v58  ;;  %v569_v58 = vmul.f32 %v2458_v61, %v2222_v35  ;;  %v596_v31 = vadd.f32 %v1786_v24, %v566_v56  ;;  %v597_v33 = vadd.f32 %v1787_v28, %v567_v27  ;;  %v571_v35 = vmul.f32 %v2458_v61, %v2236_v39  ;;  %v1791_v38 = vld [vmem:[%s2107_s25 + $0xc0] sm:$0xff]  ;;  %v1792_v40 = vld [vmem:[%s2107_s25 + $0xc8] sm:$0xff]  ;;  %v2670_v56 = vld [vmem:[%s2102_s22 + $0x31] sm:$0xff] }
  0x58   : > { %1800 = vst.msk [vmem:[%s2107_s25 + $0x18] sm:$0xff] %vm302_vm0, %v580_v0  ;;  %v1790_v0 = vld [vmem:[%s2107_s25 + $0xb8] sm:$0xff]  ;;  %v598_v1 = vadd.f32 %v1788_v32, %v568_v29  ;;  %v602_v50 = vadd.f32 %v1792_v40, %v572_v37  ;;  %v2683_v32 = vld [vmem:[%s2102_s22 + $0x41] sm:$0xff]  ;;  %v682_v48 = vld [vmem:[%s2102_s22 + $0x69] sm:$0x7f] }
  0x59   : > { %1801 = vst.msk [vmem:[%s2107_s25 + $0x20] sm:$0xff] %vm302_vm0, %v581_v2  ;;  %v599_v2 = vadd.f32 %v1789_v34, %v569_v58  ;;  %v600_v39 = vadd.f32 %v1790_v0, %v570_v36  ;;  %v601_v41 = vadd.f32 %v1791_v38, %v571_v35  ;;  %v706_v34 = vmul.f32 %v2630_v49, %v2670_v56  ;;  %v678_v36 = vld [vmem:[%s2102_s22 + $0x49] sm:$0x7f]  ;;  %v680_v40 = vld [vmem:[%s2102_s22 + $0x59] sm:$0x7f] }
  0x5a   : > { %1802 = vst.msk [vmem:[%s2107_s25 + $0x28] sm:$0xff] %vm302_vm0, %v582_v3  ;;  %v1793_v3 = vld [vmem:[%s2107_s25 + $0xd0] sm:$0xff]  ;;  %v684_v57 = vld [vmem:[%s2102_s22 + $0x79] sm:$0x7f]  ;;  %v713_v55 = vmul.f32 %v2630_v49, %v682_v48 }
  0x5b   : > { %1803 = vst.msk [vmem:[%s2107_s25 + $0x30] sm:$0xff] %vm302_vm0, %v583_v7  ;;  %v1794_v7 = vld [vmem:[%s2107_s25 + $0xd8] sm:$0xff]  ;;  %v603_v52 = vadd.f32 %v1793_v3, %v573_v42  ;;  %v1796_v54 = vld [vmem:[%s2107_s25 + $0xe8] sm:$0xff]  ;;  %v709_v3 = vmul.f32 %v2630_v49, %v678_v36 }
  0x5c   : > { %1804 = vst.msk [vmem:[%s2107_s25 + $0x38] sm:$0xff] %vm302_vm0, %v584_v8  ;;  %v1795_v8 = vld [vmem:[%s2107_s25 + $0xe0] sm:$0xff]  ;;  %v606_v63 = vadd.f32 %v1796_v54, %v576_v45  ;;  %v1797_v4 = vld [vmem:[%s2107_s25 + $0xf0] sm:$0xff]  ;;  %v711_v45 = vmul.f32 %v2630_v49, %v680_v40  ;;  %v694_v40 = vld [vmem:[%s2102_s22 + $0xc9] sm:$0x7f] }
  0x5d   : > { %1805 = vst.msk [vmem:[%s2107_s25 + $0x40] sm:$0xff] %vm302_vm0, %v585_v9  ;;  %v604_v9 = vadd.f32 %v1794_v7, %v574_v44  ;;  %v605_v60 = vadd.f32 %v1795_v8, %v575_v43  ;;  %v1798_v51 = vld [vmem:[%s2107_s25 + $0xf8] sm:$0xff]  ;;  %v607_v14 = vadd.f32 %v1797_v4, %v577_v62  ;;  %v2709_v44 = vld [vmem:[%s2102_s22 + $0x61] sm:$0xff] }
  0x5e   : > { %1806 = vst.msk [vmem:[%s2107_s25 + $0x48] sm:$0xff] %vm302_vm0, %v586_v11  ;;  %v2627_v11 = vld [vmem:[%s2102_s22 + $0x1] sm:$0xff] }
  0x5f   : > { %1807 = vst.msk [vmem:[%s2107_s25 + $0x50] sm:$0xff] %vm302_vm0, %v587_v13  ;;  %v670_v13 = vld [vmem:[%s2102_s22 + $0x9] sm:$0x7f]  ;;  %v1830_v16 = vld [vmem:[%s2107_s25 + $0x18] sm:$0x7f]  ;;  %v2735_v62 = vld [vmem:[%s2102_s22 + $0x81] sm:$0xff] }
  0x60   : > { %1808 = vst.msk [vmem:[%s2107_s25 + $0x58] sm:$0xff] %vm302_vm0, %v588_v15  ;;  %v578_v15 = vmul.f32 %v2458_v61, %v2285_v53  ;;  %v1829_v53 = vld [vmem:[%s2107_s25 + $0x10] sm:$0xff]  ;;  %v701_v61 = vmul.f32 %v2630_v49, %v670_v13 }
  0x61   : > { %1809 = vst.msk [vmem:[%s2107_s25 + $0x60] sm:$0xff] %vm302_vm0, %v589_v17  ;;  %v700_v17 = vmul.f32 %v2630_v49, %v2627_v11  ;;  %v1832_v24 = vld [vmem:[%s2107_s25 + $0x28] sm:$0x7f] }
  0x62   : > { %1810 = vst.msk [vmem:[%s2107_s25 + $0x68] sm:$0xff] %vm302_vm0, %v590_v19  ;;  %v2657_v19 = vld [vmem:[%s2102_s22 + $0x21] sm:$0xff]  ;;  %v608_v20 = vadd.f32 %v1798_v51, %v578_v15  ;;  %v731_v28 = vadd.f32 %v1830_v16, %v701_v61  ;;  %v1833_v29 = vld [vmem:[%s2107_s25 + $0x30] sm:$0xff]  ;;  %v686_v15 = vld [vmem:[%s2102_s22 + $0x89] sm:$0x7f]  ;;  %v716_v61 = vmul.f32 %v2630_v49, %v2735_v62 }
  0x63   : > { %1811 = vst.msk [vmem:[%s2107_s25 + $0x70] sm:$0xff] %vm302_vm0, %v591_v21  ;;  %v702_v21 = vmul.f32 %v2630_v49, %v2644_v5  ;;  %v704_v27 = vmul.f32 %v2630_v49, %v2657_v19 }
  0x64   : > { %1812 = vst.msk [vmem:[%s2107_s25 + $0x78] sm:$0xff] %vm302_vm0, %v592_v23  ;;  %v1831_v23 = vld [vmem:[%s2107_s25 + $0x20] sm:$0xff] }
  0x65   : > { %1813 = vst.msk [vmem:[%s2107_s25 + $0x80] sm:$0xff] %vm302_vm0, %v593_v25  ;;  %v730_v25 = vadd.f32 %v1829_v53, %v700_v17  ;;  %v732_v58 = vadd.f32 %v1831_v23, %v702_v21  ;;  %v1835_v0 = vld [vmem:[%s2107_s25 + $0x40] sm:$0xff]  ;;  %v734_v38 = vadd.f32 %v1833_v29, %v704_v27  ;;  %v1836_v37 = vld [vmem:[%s2107_s25 + $0x48] sm:$0x7f]  ;;  %v715_v17 = vmul.f32 %v2630_v49, %v684_v57  ;;  %v2776_v29 = vld [vmem:[%s2102_s22 + $0xb1] sm:$0xff] }
  0x66   : > { %1814 = vst.msk [vmem:[%s2107_s25 + $0x88] sm:$0xff] %vm302_vm0, %v594_v26  ;;  %v676_v26 = vld [vmem:[%s2102_s22 + $0x39] sm:$0x7f] }
  0x67   : > { %1815 = vst.msk [vmem:[%s2107_s25 + $0x90] sm:$0xff] %vm302_vm0, %v595_v30  ;;  %v705_v30 = vmul.f32 %v2630_v49, %v674_v18  ;;  %v707_v35 = vmul.f32 %v2630_v49, %v676_v26  ;;  %v1838_v7 = vld [vmem:[%s2107_s25 + $0x58] sm:$0x7f]  ;;  %v717_v18 = vmul.f32 %v2630_v49, %v686_v15 }
  0x68   : > { %1816 = vst.msk [vmem:[%s2107_s25 + $0x98] sm:$0xff] %vm302_vm0, %v596_v31  ;;  %v1834_v31 = vld [vmem:[%s2107_s25 + $0x38] sm:$0x7f]  ;;  %v1839_v8 = vld [vmem:[%s2107_s25 + $0x60] sm:$0xff]  ;;  %v739_v59 = vadd.f32 %v1838_v7, %v709_v3 }
  0x69   : > { %1817 = vst.msk [vmem:[%s2107_s25 + $0xa0] sm:$0xff] %vm302_vm0, %v597_v33  ;;  %v733_v33 = vadd.f32 %v1832_v24, %v703_v22  ;;  %v735_v42 = vadd.f32 %v1834_v31, %v705_v30  ;;  %v1840_v47 = vld [vmem:[%s2107_s25 + $0x68] sm:$0x7f] }
  0x6a   : > { %1818 = vst.msk [vmem:[%s2107_s25 + $0xa8] sm:$0xff] %vm302_vm0, %v598_v1  ;;  %v2696_v1 = vld [vmem:[%s2102_s22 + $0x51] sm:$0xff]  ;;  %v690_v24 = vld [vmem:[%s2102_s22 + $0xa9] sm:$0x7f] }
  0x6b   : > { %1819 = vst.msk [vmem:[%s2107_s25 + $0xb0] sm:$0xff] %vm302_vm0, %v599_v2  ;;  %v708_v2 = vmul.f32 %v2630_v49, %v2683_v32  ;;  %v710_v43 = vmul.f32 %v2630_v49, %v2696_v1 }
  0x6c   : > { %1820 = vst.msk [vmem:[%s2107_s25 + $0xb8] sm:$0xff] %vm302_vm0, %v600_v39  ;;  %v1837_v39 = vld [vmem:[%s2107_s25 + $0x50] sm:$0xff]  ;;  %v1843_v51 = vld [vmem:[%s2107_s25 + $0x80] sm:$0xff] }
  0x6d   : > { %1821 = vst.msk [vmem:[%s2107_s25 + $0xc0] sm:$0xff] %vm302_vm0, %v601_v41  ;;  %v736_v41 = vadd.f32 %v1835_v0, %v706_v34  ;;  %v738_v54 = vadd.f32 %v1837_v39, %v708_v2  ;;  %v740_v13 = vadd.f32 %v1839_v8, %v710_v43  ;;  %v1844_v53 = vld [vmem:[%s2107_s25 + $0x88] sm:$0x7f]  ;;  %v692_v34 = vld [vmem:[%s2102_s22 + $0xb9] sm:$0x7f]  ;;  %v721_v0 = vmul.f32 %v2630_v49, %v690_v24  ;;  %v2854_v24 = vld [vmem:[%s2102_s22 + $0x20] sm:$0xff] }
  0x6e   : > { %1822 = vst.msk [vmem:[%s2107_s25 + $0xc8] sm:$0xff] %vm302_vm0, %v602_v50  ;;  %v737_v50 = vadd.f32 %v1836_v37, %v707_v35  ;;  %v1845_v21 = vld [vmem:[%s2107_s25 + $0x90] sm:$0xff]  ;;  %v745_v27 = vadd.f32 %v1844_v53, %v715_v17  ;;  %v2789_v35 = vld [vmem:[%s2102_s22 + $0xc1] sm:$0xff]  ;;  %v722_v2 = vmul.f32 %v2630_v49, %v2776_v29  ;;  %v723_v3 = vmul.f32 %v2630_v49, %v692_v34  ;;  %v698_v17 = vld [vmem:[%s2102_s22 + $0xe9] sm:$0x7f] }
  0x6f   : > { %1823 = vst.msk [vmem:[%s2107_s25 + $0xd0] sm:$0xff] %vm302_vm0, %v603_v52  ;;  %v2722_v52 = vld [vmem:[%s2102_s22 + $0x71] sm:$0xff]  ;;  %v746_v30 = vadd.f32 %v1845_v21, %v716_v61  ;;  %v724_v48 = vmul.f32 %v2630_v49, %v2789_v35 }
  0x70   : > { %1824 = vst.msk [vmem:[%s2107_s25 + $0xd8] sm:$0xff] %vm302_vm0, %v604_v9  ;;  %v712_v9 = vmul.f32 %v2630_v49, %v2709_v44  ;;  %v714_v4 = vmul.f32 %v2630_v49, %v2722_v52  ;;  %v1846_v22 = vld [vmem:[%s2107_s25 + $0x98] sm:$0x7f]  ;;  %v1847_v26 = vld [vmem:[%s2107_s25 + $0xa0] sm:$0xff]  ;;  %v2867_v34 = vld [vmem:[%s2102_s22 + $0x30] sm:$0xff] }
  0x71   : > { %1825 = vst.msk [vmem:[%s2107_s25 + $0xe0] sm:$0xff] %vm302_vm0, %v605_v60  ;;  %v1841_v60 = vld [vmem:[%s2107_s25 + $0x70] sm:$0xff]  ;;  %v747_v36 = vadd.f32 %v1846_v22, %v717_v18  ;;  %v825_v18 = vld [vmem:[%s2102_s22 + $0x18] sm:$0x7f] }
  0x72   : > { %1826 = vst.msk [vmem:[%s2107_s25 + $0xe8] sm:$0xff] %vm302_vm0, %v606_v63  ;;  %v1842_v63 = vld [vmem:[%s2107_s25 + $0x78] sm:$0x7f]  ;;  %v744_v23 = vadd.f32 %v1843_v51, %v714_v4  ;;  %v2828_v4 = vld [vmem:[%s2102_s22 + $0xe1] sm:$0xff] }
  0x73   : > { %919 = vst.msk [vmem:[%s2107_s25 + $0x1] sm:$0xff] %vm302_vm0, %v887_v6  ;;  %v741_v6 = vadd.f32 %v1840_v47, %v711_v45  ;;  %v743_v16 = vadd.f32 %v1842_v63, %v713_v55  ;;  %v1850_v37 = vld [vmem:[%s2107_s25 + $0xb8] sm:$0x7f]  ;;  %v2815_v47 = vstv %s2763_s30 }
  0x74   : > { %920 = vst.msk [vmem:[%s2107_s25 + $0x9] sm:$0x7f] %vm458_vm1, %v888_v12  ;;  %v742_v12 = vadd.f32 %v1841_v60, %v712_v9  ;;  %v1851_v39 = vld [vmem:[%s2107_s25 + $0xc0] sm:$0xff]  ;;  %v751_v8 = vadd.f32 %v1850_v37, %v721_v0  ;;  %v984_v60 = vld [vmem:[%s2102_s22 + $0x9] sm:$0x7f]  ;;  %v1016_v51 = vmul.f32 %v2815_v47, %v2627_v11  ;;  %v728_v11 = vmul.f32 %v2630_v49, %v2828_v4 }
  0x75   : > { %1827 = vst.msk [vmem:[%s2107_s25 + $0xf0] sm:$0xff] %vm302_vm0, %v607_v14  ;;  %v688_v14 = vld [vmem:[%s2102_s22 + $0x99] sm:$0x7f]  ;;  %v1852_v43 = vld [vmem:[%s2107_s25 + $0xc8] sm:$0x7f]  ;;  %v752_v9 = vadd.f32 %v1851_v39, %v722_v2  ;;  %v1017_v61 = vmul.f32 %v2815_v47, %v984_v60  ;;  %v859_v0 = vmul.f32 %v2604_v46, %v2854_v24 }
  0x76   : > { %1828 = vst.msk [vmem:[%s2107_s25 + $0xf8] sm:$0xff] %vm302_vm0, %v608_v20  ;;  %v2761_v20 = vld [vmem:[%s2102_s22 + $0xa1] sm:$0xff]  ;;  %v1853_v45 = vld [vmem:[%s2107_s25 + $0xd0] sm:$0xff]  ;;  %v753_v55 = vadd.f32 %v1852_v43, %v723_v3 }
  0x77   : > { %1859 = vst.msk [vmem:[%s2107_s25 + $0x10] sm:$0xff] %vm302_vm0, %v730_v25  ;;  %v718_v25 = vmul.f32 %v2630_v49, %v2748_v10  ;;  %v720_v31 = vmul.f32 %v2630_v49, %v2761_v20  ;;  %v1854_v57 = vld [vmem:[%s2107_s25 + $0xd8] sm:$0x7f]  ;;  %v754_v15 = vadd.f32 %v1853_v45, %v724_v48  ;;  %v831_v43 = vld [vmem:[%s2102_s22 + $0x48] sm:$0x7f]  ;;  %v2893_v45 = vld [vmem:[%s2102_s22 + $0x50] sm:$0xff] }
  0x78   : > { %1860 = vst.msk [vmem:[%s2107_s25 + $0x18] sm:$0x7f] %vm458_vm1, %v731_v28  ;;  %v719_v28 = vmul.f32 %v2630_v49, %v688_v14  ;;  %v2841_v14 = vld [vmem:[%s2102_s22 + $0x10] sm:$0xff] }
  0x79   : > { %1861 = vst.msk [vmem:[%s2107_s25 + $0x20] sm:$0xff] %vm302_vm0, %v732_v58  ;;  %v1848_v58 = vld [vmem:[%s2107_s25 + $0xa8] sm:$0x7f] }
  0x7a   : > { %1862 = vst.msk [vmem:[%s2107_s25 + $0x28] sm:$0x7f] %vm458_vm1, %v733_v33  ;;  %v1849_v33 = vld [vmem:[%s2107_s25 + $0xb0] sm:$0xff]  ;;  %v951_v53 = vld [vmem:[%s2107_s25] sm:$0xff] }
  0x7b   : > { %1863 = vst.msk [vmem:[%s2107_s25 + $0x30] sm:$0xff] %vm302_vm0, %v734_v38  ;;  %v748_v38 = vadd.f32 %v1847_v26, %v718_v25  ;;  %v750_v7 = vadd.f32 %v1849_v33, %v720_v31  ;;  %v952_v21 = vld [vmem:[%s2107_s25 + $0x8] sm:$0x7f]  ;;  %v729_v25 = vmul.f32 %v2630_v49, %v698_v17  ;;  %v858_v31 = vmul.f32 %v2604_v46, %v825_v18 }
  0x7c   : > { %1864 = vst.msk [vmem:[%s2107_s25 + $0x38] sm:$0x7f] %vm458_vm1, %v735_v42  ;;  %v749_v42 = vadd.f32 %v1848_v58, %v719_v28  ;;  %v1857_v22 = vld [vmem:[%s2107_s25 + $0xf0] sm:$0xff]  ;;  %v857_v28 = vmul.f32 %v2604_v46, %v2841_v14  ;;  %v1049_v58 = vadd.f32 %v1017_v61, %v952_v21  ;;  %v835_v17 = vld [vmem:[%s2102_s22 + $0x68] sm:$0x7f] }
  0x7d   : > { %1865 = vst.msk [vmem:[%s2107_s25 + $0x40] sm:$0xff] %vm302_vm0, %v736_v41  ;;  %v2802_v41 = vld [vmem:[%s2102_s22 + $0xd1] sm:$0xff] }
  0x7e   : > { %1866 = vst.msk [vmem:[%s2107_s25 + $0x48] sm:$0x7f] %vm458_vm1, %v737_v50  ;;  %v696_v50 = vld [vmem:[%s2102_s22 + $0xd9] sm:$0x7f] }
  0x7f   : > { %1867 = vst.msk [vmem:[%s2107_s25 + $0x50] sm:$0xff] %vm302_vm0, %v738_v54  ;;  %v725_v54 = vmul.f32 %v2630_v49, %v694_v40  ;;  %v727_v63 = vmul.f32 %v2630_v49, %v696_v50  ;;  %v1858_v26 = vld [vmem:[%s2107_s25 + $0xf8] sm:$0x7f] }
  0x80   : > { %1868 = vst.msk [vmem:[%s2107_s25 + $0x58] sm:$0x7f] %vm458_vm1, %v739_v59  ;;  %v726_v59 = vmul.f32 %v2630_v49, %v2802_v41  ;;  %v792_v49 = vld [vmem:[%s2107_s25 + $0x11] sm:$0xff]  ;;  %v793_v33 = vld [vmem:[%s2107_s25 + $0x19] sm:$0x7f]  ;;  %v759_v37 = vadd.f32 %v1858_v26, %v729_v25  ;;  %v2932_v26 = vld [vmem:[%s2102_s22 + $0x80] sm:$0xff] }
  0x81   : > { %1869 = vst.msk [vmem:[%s2107_s25 + $0x60] sm:$0xff] %vm302_vm0, %v740_v13  ;;  %v1855_v13 = vld [vmem:[%s2107_s25 + $0xe0] sm:$0xff]  ;;  %v889_v39 = vadd.f32 %v857_v28, %v792_v49  ;;  %v795_v3 = vld [vmem:[%s2107_s25 + $0x29] sm:$0x7f]  ;;  %v890_v48 = vadd.f32 %v858_v31, %v793_v33 }
  0x82   : > { %1870 = vst.msk [vmem:[%s2107_s25 + $0x68] sm:$0x7f] %vm458_vm1, %v741_v6  ;;  %v1856_v6 = vld [vmem:[%s2107_s25 + $0xe8] sm:$0x7f] }
  0x83   : > { %1871 = vst.msk [vmem:[%s2107_s25 + $0x70] sm:$0xff] %vm302_vm0, %v742_v12  ;;  %v755_v12 = vadd.f32 %v1854_v57, %v725_v54  ;;  %v794_v2 = vld [vmem:[%s2107_s25 + $0x21] sm:$0xff]  ;;  %v796_v50 = vld [vmem:[%s2107_s25 + $0x31] sm:$0xff] }
  0x84   : > { %1872 = vst.msk [vmem:[%s2107_s25 + $0x78] sm:$0x7f] %vm458_vm1, %v743_v16  ;;  %v756_v16 = vadd.f32 %v1855_v13, %v726_v59  ;;  %v891_v54 = vadd.f32 %v859_v0, %v794_v2  ;;  %v833_v59 = vld [vmem:[%s2102_s22 + $0x58] sm:$0x7f]  ;;  %v864_v13 = vmul.f32 %v2604_v46, %v831_v43  ;;  %v839_v49 = vld [vmem:[%s2102_s22 + $0x88] sm:$0x7f]  ;;  %v871_v2 = vmul.f32 %v2604_v46, %v2932_v26 }
  0x85   : > { %1873 = vst.msk [vmem:[%s2107_s25 + $0x80] sm:$0xff] %vm302_vm0, %v744_v23  ;;  %v757_v23 = vadd.f32 %v1856_v6, %v727_v63  ;;  %v2906_v63 = vld [vmem:[%s2102_s22 + $0x60] sm:$0xff]  ;;  %v799_v6 = vld [vmem:[%s2107_s25 + $0x49] sm:$0x7f]  ;;  %v866_v61 = vmul.f32 %v2604_v46, %v833_v59  ;;  %v2945_v0 = vld [vmem:[%s2102_s22 + $0x90] sm:$0xff] }
  0x86   : > { %1874 = vst.msk [vmem:[%s2107_s25 + $0x88] sm:$0x7f] %vm458_vm1, %v745_v27  ;;  %v1048_v27 = vadd.f32 %v1016_v51, %v951_v53  ;;  %v865_v51 = vmul.f32 %v2604_v46, %v2893_v45  ;;  %v867_v18 = vmul.f32 %v2604_v46, %v2906_v63  ;;  %v2958_v43 = vld [vmem:[%s2102_s22 + $0xa0] sm:$0xff] }
  0x87   : > { %1875 = vst.msk [vmem:[%s2107_s25 + $0x90] sm:$0xff] %vm302_vm0, %v746_v30  ;;  %v827_v30 = vld [vmem:[%s2102_s22 + $0x28] sm:$0x7f]  ;;  %v800_v53 = vld [vmem:[%s2107_s25 + $0x51] sm:$0xff] }
  0x88   : > { %1876 = vst.msk [vmem:[%s2107_s25 + $0x98] sm:$0x7f] %vm458_vm1, %v747_v36  ;;  %v758_v36 = vadd.f32 %v1857_v22, %v728_v11  ;;  %v860_v40 = vmul.f32 %v2604_v46, %v827_v30  ;;  %v801_v11 = vld [vmem:[%s2107_s25 + $0x59] sm:$0x7f]  ;;  %v896_v22 = vadd.f32 %v864_v13, %v799_v6  ;;  %v897_v28 = vadd.f32 %v865_v51, %v800_v53  ;;  %v2986_v53 = vld [vmem:[%s2102_s22 + $0xc0] sm:$0xff] }
  0x89   : > { %1877 = vst.msk [vmem:[%s2107_s25 + $0xa0] sm:$0xff] %vm302_vm0, %v748_v38  ;;  %v829_v38 = vld [vmem:[%s2102_s22 + $0x38] sm:$0x7f]  ;;  %v802_v25 = vld [vmem:[%s2107_s25 + $0x61] sm:$0xff]  ;;  %v803_v30 = vld [vmem:[%s2107_s25 + $0x69] sm:$0x7f]  ;;  %v898_v31 = vadd.f32 %v866_v61, %v801_v11 }
  0x8a   : > { %1878 = vst.msk [vmem:[%s2107_s25 + $0xa8] sm:$0x7f] %vm458_vm1, %v749_v42  ;;  %v2880_v42 = vld [vmem:[%s2102_s22 + $0x40] sm:$0xff]  ;;  %v892_v60 = vadd.f32 %v860_v40, %v795_v3  ;;  %v841_v40 = vld [vmem:[%s2102_s22 + $0x98] sm:$0x7f] }
  0x8b   : > { %1879 = vst.msk [vmem:[%s2107_s25 + $0xb0] sm:$0xff] %vm302_vm0, %v750_v7  ;;  %v861_v7 = vmul.f32 %v2604_v46, %v2867_v34  ;;  %v863_v57 = vmul.f32 %v2604_v46, %v2880_v42  ;;  %v874_v59 = vmul.f32 %v2604_v46, %v841_v40  ;;  %v845_v6 = vld [vmem:[%s2102_s22 + $0xb8] sm:$0x7f] }
  0x8c   : > { %1880 = vst.msk [vmem:[%s2107_s25 + $0xb8] sm:$0x7f] %vm458_vm1, %v751_v8  ;;  %v862_v8 = vmul.f32 %v2604_v46, %v829_v38  ;;  %v899_v38 = vadd.f32 %v867_v18, %v802_v25  ;;  %v847_v18 = vld [vmem:[%s2102_s22 + $0xc8] sm:$0x7f]  ;;  %v878_v25 = vmul.f32 %v2604_v46, %v845_v6 }
  0x8d   : > { %1881 = vst.msk [vmem:[%s2107_s25 + $0xc0] sm:$0xff] %vm302_vm0, %v752_v9  ;;  %v797_v9 = vld [vmem:[%s2107_s25 + $0x39] sm:$0x7f]  ;;  %v806_v3 = vld [vmem:[%s2107_s25 + $0x81] sm:$0xff] }
  0x8e   : > { %1882 = vst.msk [vmem:[%s2107_s25 + $0xc8] sm:$0x7f] %vm458_vm1, %v753_v55  ;;  %v798_v55 = vld [vmem:[%s2107_s25 + $0x41] sm:$0xff] }
  0x8f   : > { %1883 = vst.msk [vmem:[%s2107_s25 + $0xd0] sm:$0xff] %vm302_vm0, %v754_v15  ;;  %v893_v15 = vadd.f32 %v861_v7, %v796_v50  ;;  %v895_v21 = vadd.f32 %v863_v57, %v798_v55  ;;  %v872_v7 = vmul.f32 %v2604_v46, %v839_v49  ;;  %v807_v50 = vld [vmem:[%s2107_s25 + $0x89] sm:$0x7f]  ;;  %v808_v57 = vld [vmem:[%s2107_s25 + $0x91] sm:$0xff]  ;;  %v903_v55 = vadd.f32 %v871_v2, %v806_v3  ;;  %v809_v13 = vld [vmem:[%s2107_s25 + $0x99] sm:$0x7f] }
  0x90   : > { %1884 = vst.msk [vmem:[%s2107_s25 + $0xd8] sm:$0x7f] %vm458_vm1, %v755_v12  ;;  %v894_v12 = vadd.f32 %v862_v8, %v797_v9  ;;  %v873_v8 = vmul.f32 %v2604_v46, %v2945_v0  ;;  %v849_v49 = vld [vmem:[%s2102_s22 + $0xd8] sm:$0x7f] }
  0x91   : > { %1885 = vst.msk [vmem:[%s2107_s25 + $0xe0] sm:$0xff] %vm302_vm0, %v756_v16  ;;  %v2919_v16 = vld [vmem:[%s2102_s22 + $0x70] sm:$0xff]  ;;  %v904_v51 = vadd.f32 %v872_v7, %v807_v50  ;;  %v3025_v50 = vstv %s2973_s3 }
  0x92   : > { %1886 = vst.msk [vmem:[%s2107_s25 + $0xe8] sm:$0x7f] %vm458_vm1, %v757_v23  ;;  %v837_v23 = vld [vmem:[%s2102_s22 + $0x78] sm:$0x7f]  ;;  %v905_v61 = vadd.f32 %v873_v8, %v808_v57  ;;  %v3033_v57 = vld [vmem:[%s2102_s22 + $0xf0] sm:$0xff] }
  0x93   : > { %1080 = vst.msk [vmem:[%s2107_s25] sm:$0xff] %vm302_vm0, %v1048_v27  ;;  %v868_v27 = vmul.f32 %v2604_v46, %v835_v17  ;;  %v870_v33 = vmul.f32 %v2604_v46, %v837_v23  ;;  %v810_v17 = vld [vmem:[%s2107_s25 + $0xa1] sm:$0xff]  ;;  %v906_v23 = vadd.f32 %v874_v59, %v809_v13 }
  0x94   : > { %1081 = vst.msk [vmem:[%s2107_s25 + $0x8] sm:$0x7f] %vm458_vm1, %v1049_v58  ;;  %v869_v58 = vmul.f32 %v2604_v46, %v2919_v16 }
  0x95   : > { %1887 = vst.msk [vmem:[%s2107_s25 + $0xf0] sm:$0xff] %vm302_vm0, %v758_v36  ;;  %v804_v36 = vld [vmem:[%s2107_s25 + $0x71] sm:$0xff]  ;;  %v815_v2 = vld [vmem:[%s2107_s25 + $0xc9] sm:$0x7f] }
  0x96   : > { %1888 = vst.msk [vmem:[%s2107_s25 + $0xf8] sm:$0x7f] %vm458_vm1, %v759_v37  ;;  %v805_v37 = vld [vmem:[%s2107_s25 + $0x79] sm:$0x7f] }
  0x97   : > { %921 = vst.msk [vmem:[%s2107_s25 + $0x11] sm:$0xff] %vm302_vm0, %v889_v39  ;;  %v900_v39 = vadd.f32 %v868_v27, %v803_v30  ;;  %v902_v9 = vadd.f32 %v870_v33, %v805_v37  ;;  %v2999_v27 = vld [vmem:[%s2102_s22 + $0xd0] sm:$0xff]  ;;  %v813_v30 = vld [vmem:[%s2107_s25 + $0xb9] sm:$0x7f]  ;;  %v880_v33 = vmul.f32 %v2604_v46, %v847_v18 }
  0x98   : > { %922 = vst.msk [vmem:[%s2107_s25 + $0x19] sm:$0x7f] %vm458_vm1, %v890_v48  ;;  %v901_v48 = vadd.f32 %v869_v58, %v804_v36  ;;  %v879_v58 = vmul.f32 %v2604_v46, %v2986_v53  ;;  %v814_v36 = vld [vmem:[%s2107_s25 + $0xc1] sm:$0xff]  ;;  %v881_v40 = vmul.f32 %v2604_v46, %v2999_v27  ;;  %v910_v3 = vadd.f32 %v878_v25, %v813_v30  ;;  %v816_v7 = vld [vmem:[%s2107_s25 + $0xd1] sm:$0xff] }
  0x99   : > { %923 = vst.msk [vmem:[%s2107_s25 + $0x21] sm:$0xff] %vm302_vm0, %v891_v54  ;;  %v843_v54 = vld [vmem:[%s2102_s22 + $0xa8] sm:$0x7f]  ;;  %v912_v59 = vadd.f32 %v880_v33, %v815_v2 }
  0x9a   : > { %924 = vst.msk [vmem:[%s2107_s25 + $0x29] sm:$0x7f] %vm458_vm1, %v892_v60  ;;  %v2971_v60 = vld [vmem:[%s2102_s22 + $0xb0] sm:$0xff]  ;;  %v911_v8 = vadd.f32 %v879_v58, %v814_v36  ;;  %v819_v6 = vld [vmem:[%s2107_s25 + $0xe9] sm:$0x7f] }
  0x9b   : > { %925 = vst.msk [vmem:[%s2107_s25 + $0x31] sm:$0xff] %vm302_vm0, %v893_v15  ;;  %v875_v15 = vmul.f32 %v2604_v46, %v2958_v43  ;;  %v877_v11 = vmul.f32 %v2604_v46, %v2971_v60 }
  0x9c   : > { %926 = vst.msk [vmem:[%s2107_s25 + $0x39] sm:$0x7f] %vm458_vm1, %v894_v12  ;;  %v876_v12 = vmul.f32 %v2604_v46, %v843_v54  ;;  %v817_v54 = vld [vmem:[%s2107_s25 + $0xd9] sm:$0x7f] }
  0x9d   : > { %927 = vst.msk [vmem:[%s2107_s25 + $0x41] sm:$0xff] %vm302_vm0, %v895_v21  ;;  %v811_v21 = vld [vmem:[%s2107_s25 + $0xa9] sm:$0x7f]  ;;  %v820_v18 = vld [vmem:[%s2107_s25 + $0xf1] sm:$0xff] }
  0x9e   : > { %928 = vst.msk [vmem:[%s2107_s25 + $0x49] sm:$0x7f] %vm458_vm1, %v896_v22  ;;  %v812_v22 = vld [vmem:[%s2107_s25 + $0xb1] sm:$0xff] }
  0x9f   : > { %929 = vst.msk [vmem:[%s2107_s25 + $0x51] sm:$0xff] %vm302_vm0, %v897_v28  ;;  %v907_v28 = vadd.f32 %v875_v15, %v810_v17  ;;  %v909_v37 = vadd.f32 %v877_v11, %v812_v22  ;;  %v913_v15 = vadd.f32 %v881_v40, %v816_v7  ;;  %v986_v17 = vld [vmem:[%s2102_s22 + $0x19] sm:$0x7f]  ;;  %v988_v22 = vld [vmem:[%s2102_s22 + $0x29] sm:$0x7f] }
  0xa0   : > { %930 = vst.msk [vmem:[%s2107_s25 + $0x59] sm:$0x7f] %vm458_vm1, %v898_v31  ;;  %v908_v31 = vadd.f32 %v876_v12, %v811_v21  ;;  %v885_v21 = vmul.f32 %v2604_v46, %v3033_v57  ;;  %v1019_v30 = vmul.f32 %v2815_v47, %v986_v17  ;;  %v955_v33 = vld [vmem:[%s2107_s25 + $0x20] sm:$0xff] }
  0xa1   : > { %931 = vst.msk [vmem:[%s2107_s25 + $0x61] sm:$0xff] %vm302_vm0, %v899_v38  ;;  %v3012_v38 = vld [vmem:[%s2102_s22 + $0xe0] sm:$0xff]  ;;  %v956_v40 = vld [vmem:[%s2107_s25 + $0x28] sm:$0x7f] }
  0xa2   : > { %932 = vst.msk [vmem:[%s2107_s25 + $0x69] sm:$0x7f] %vm458_vm1, %v900_v39  ;;  %v851_v39 = vld [vmem:[%s2102_s22 + $0xe8] sm:$0x7f]  ;;  %v917_v36 = vadd.f32 %v885_v21, %v820_v18  ;;  %v957_v7 = vld [vmem:[%s2107_s25 + $0x30] sm:$0xff]  ;;  %v1028_v18 = vmul.f32 %v2815_v47, %v2709_v44 }
  0xa3   : > { %933 = vst.msk [vmem:[%s2107_s25 + $0x71] sm:$0xff] %vm302_vm0, %v901_v48  ;;  %v882_v48 = vmul.f32 %v2604_v46, %v849_v49  ;;  %v884_v13 = vmul.f32 %v2604_v46, %v851_v39  ;;  %v954_v49 = vld [vmem:[%s2107_s25 + $0x18] sm:$0x7f]  ;;  %v1022_v39 = vmul.f32 %v2815_v47, %v2670_v56  ;;  %v1000_v44 = vld [vmem:[%s2102_s22 + $0x89] sm:$0x7f] }
  0xa4   : > { %934 = vst.msk [vmem:[%s2107_s25 + $0x79] sm:$0x7f] %vm458_vm1, %v902_v9  ;;  %v883_v9 = vmul.f32 %v2604_v46, %v3012_v38  ;;  %v994_v56 = vld [vmem:[%s2102_s22 + $0x59] sm:$0x7f] }
  0xa5   : > { %935 = vst.msk [vmem:[%s2107_s25 + $0x81] sm:$0xff] %vm302_vm0, %v903_v55  ;;  %v818_v55 = vld [vmem:[%s2107_s25 + $0xe1] sm:$0xff]  ;;  %v914_v12 = vadd.f32 %v882_v48, %v817_v54  ;;  %v916_v25 = vadd.f32 %v884_v13, %v819_v6  ;;  %v958_v54 = vld [vmem:[%s2107_s25 + $0x38] sm:$0x7f] }
  0xa6   : > { %936 = vst.msk [vmem:[%s2107_s25 + $0x89] sm:$0x7f] %vm458_vm1, %v904_v51  ;;  %v1174_v51 = vmul.f32 %v3025_v50, %v2841_v14  ;;  %v915_v11 = vadd.f32 %v883_v9, %v818_v55  ;;  %v1024_v9 = vmul.f32 %v2815_v47, %v2683_v32  ;;  %v959_v55 = vld [vmem:[%s2107_s25 + $0x40] sm:$0xff]  ;;  %v960_v6 = vld [vmem:[%s2107_s25 + $0x48] sm:$0x7f] }
  0xa7   : > { %937 = vst.msk [vmem:[%s2107_s25 + $0x91] sm:$0xff] %vm302_vm0, %v905_v61  ;;  %v1112_v61 = vld [vmem:[%s2107_s25 + $0x1] sm:$0xff]  ;;  %v996_v32 = vld [vmem:[%s2102_s22 + $0x69] sm:$0x7f] }
  0xa8   : > { %938 = vst.msk [vmem:[%s2107_s25 + $0x99] sm:$0x7f] %vm458_vm1, %v906_v23  ;;  %v1018_v23 = vmul.f32 %v2815_v47, %v2644_v5  ;;  %v1204_v58 = vadd.f32 %v1174_v51, %v1112_v61  ;;  %v990_v5 = vld [vmem:[%s2102_s22 + $0x39] sm:$0x7f]  ;;  %v1026_v51 = vmul.f32 %v2815_v47, %v2696_v1  ;;  %v1027_v61 = vmul.f32 %v2815_v47, %v994_v56 }
  0xa9   : > { %939 = vst.msk [vmem:[%s2107_s25 + $0xa1] sm:$0xff] %vm302_vm0, %v907_v28  ;;  %v953_v28 = vld [vmem:[%s2107_s25 + $0x10] sm:$0xff]  ;;  %v1023_v48 = vmul.f32 %v2815_v47, %v990_v5  ;;  %v1056_v21 = vadd.f32 %v1024_v9, %v959_v55  ;;  %v998_v1 = vld [vmem:[%s2102_s22 + $0x79] sm:$0x7f] }
  0xaa   : > { %940 = vst.msk [vmem:[%s2107_s25 + $0xa9] sm:$0x7f] %vm458_vm1, %v908_v31  ;;  %v1020_v31 = vmul.f32 %v2815_v47, %v2657_v19  ;;  %v1050_v2 = vadd.f32 %v1018_v23, %v953_v28  ;;  %v992_v19 = vld [vmem:[%s2102_s22 + $0x49] sm:$0x7f]  ;;  %v1031_v5 = vmul.f32 %v2815_v47, %v998_v1 }
  0xab   : > { %941 = vst.msk [vmem:[%s2107_s25 + $0xb1] sm:$0xff] %vm302_vm0, %v909_v37  ;;  %v1021_v37 = vmul.f32 %v2815_v47, %v988_v22  ;;  %v1025_v13 = vmul.f32 %v2815_v47, %v992_v19  ;;  %v1055_v17 = vadd.f32 %v1023_v48, %v958_v54  ;;  %v963_v22 = vld [vmem:[%s2107_s25 + $0x60] sm:$0xff] }
  0xac   : > { %942 = vst.msk [vmem:[%s2107_s25 + $0xb9] sm:$0x7f] %vm458_vm1, %v910_v3  ;;  %v1051_v3 = vadd.f32 %v1019_v30, %v954_v49  ;;  %v964_v30 = vld [vmem:[%s2107_s25 + $0x68] sm:$0x7f] }
  0xad   : > { %943 = vst.msk [vmem:[%s2107_s25 + $0xc1] sm:$0xff] %vm302_vm0, %v911_v8  ;;  %v1052_v8 = vadd.f32 %v1020_v31, %v955_v33  ;;  %v1057_v23 = vadd.f32 %v1025_v13, %v960_v6  ;;  %v965_v31 = vld [vmem:[%s2107_s25 + $0x70] sm:$0xff]  ;;  %v966_v33 = vld [vmem:[%s2107_s25 + $0x78] sm:$0x7f] }
  0xae   : > { %944 = vst.msk [vmem:[%s2107_s25 + $0xc9] sm:$0x7f] %vm458_vm1, %v912_v59  ;;  %v1053_v59 = vadd.f32 %v1021_v37, %v956_v40  ;;  %v1032_v37 = vmul.f32 %v2815_v47, %v2735_v62  ;;  %v967_v40 = vld [vmem:[%s2107_s25 + $0x80] sm:$0xff]  ;;  %v1004_v62 = vld [vmem:[%s2102_s22 + $0xa9] sm:$0x7f]  ;;  %v1063_v48 = vadd.f32 %v1031_v5, %v966_v33  ;;  %v3189_v33 = vstv %s3140_s4 }
  0xaf   : > { %945 = vst.msk [vmem:[%s2107_s25 + $0xd1] sm:$0xff] %vm302_vm0, %v913_v15  ;;  %v1054_v15 = vadd.f32 %v1022_v39, %v957_v7  ;;  %v1033_v39 = vmul.f32 %v2815_v47, %v1000_v44  ;;  %v1034_v7 = vmul.f32 %v2815_v47, %v2748_v10  ;;  %v970_v56 = vld [vmem:[%s2107_s25 + $0x98] sm:$0x7f]  ;;  %v1036_v10 = vmul.f32 %v2815_v47, %v2761_v20  ;;  %v1008_v20 = vld [vmem:[%s2102_s22 + $0xc9] sm:$0x7f] }
  0xb0   : > { %946 = vst.msk [vmem:[%s2107_s25 + $0xd9] sm:$0x7f] %vm458_vm1, %v914_v12  ;;  %v961_v12 = vld [vmem:[%s2107_s25 + $0x50] sm:$0xff]  ;;  %v1064_v9 = vadd.f32 %v1032_v37, %v967_v40  ;;  %v971_v13 = vld [vmem:[%s2107_s25 + $0xa0] sm:$0xff]  ;;  %v853_v40 = vld [vmem:[%s2102_s22 + $0xf8] sm:$0x7f] }
  0xb1   : > { %947 = vst.msk [vmem:[%s2107_s25 + $0xe1] sm:$0xff] %vm302_vm0, %v915_v11  ;;  %v962_v11 = vld [vmem:[%s2107_s25 + $0x58] sm:$0x7f]  ;;  %v1058_v28 = vadd.f32 %v1026_v51, %v961_v12  ;;  %v972_v51 = vld [vmem:[%s2107_s25 + $0xa8] sm:$0x7f] }
  0xb2   : > { %948 = vst.msk [vmem:[%s2107_s25 + $0xe9] sm:$0x7f] %vm458_vm1, %v916_v25  ;;  %v1029_v25 = vmul.f32 %v2815_v47, %v996_v32  ;;  %v1059_v49 = vadd.f32 %v1027_v61, %v962_v11  ;;  %v1038_v32 = vmul.f32 %v2815_v47, %v2776_v29  ;;  %v973_v12 = vld [vmem:[%s2107_s25 + $0xb0] sm:$0xff]  ;;  %v1010_v29 = vld [vmem:[%s2102_s22 + $0xd9] sm:$0x7f] }
  0xb3   : > { %1234 = vst.msk [vmem:[%s2107_s25 + $0x1] sm:$0xff] %vm302_vm0, %v1204_v58  ;;  %v1030_v58 = vmul.f32 %v2815_v47, %v2722_v52  ;;  %v1002_v52 = vld [vmem:[%s2102_s22 + $0x99] sm:$0x7f] }
  0xb4   : > { %949 = vst.msk [vmem:[%s2107_s25 + $0xf1] sm:$0xff] %vm302_vm0, %v917_v36  ;;  %v1060_v36 = vadd.f32 %v1028_v18, %v963_v22  ;;  %v1035_v54 = vmul.f32 %v2815_v47, %v1002_v52  ;;  %v974_v11 = vld [vmem:[%s2107_s25 + $0xb8] sm:$0x7f]  ;;  %v1040_v18 = vmul.f32 %v2815_v47, %v2789_v35  ;;  %v1041_v22 = vmul.f32 %v2815_v47, %v1008_v20  ;;  %v1012_v35 = vld [vmem:[%s2102_s22 + $0xe9] sm:$0x7f] }
  0xb5   : > { %1082 = vst.msk [vmem:[%s2107_s25 + $0x10] sm:$0xff] %vm302_vm0, %v1050_v2  ;;  %v1061_v2 = vadd.f32 %v1029_v25, %v964_v30  ;;  %v1062_v19 = vadd.f32 %v1030_v58, %v965_v31  ;;  %v1070_v25 = vadd.f32 %v1038_v32, %v973_v12  ;;  %v1042_v30 = vmul.f32 %v2815_v47, %v2802_v41  ;;  %v1890_v31 = vld [vmem:[%s2102_s22 + $0x18] sm:$0x7f] }
  0xb6   : > { %1083 = vst.msk [vmem:[%s2107_s25 + $0x18] sm:$0x7f] %vm458_vm1, %v1051_v3  ;;  %v968_v3 = vld [vmem:[%s2107_s25 + $0x88] sm:$0x7f]  ;;  %v977_v44 = vld [vmem:[%s2107_s25 + $0xd0] sm:$0xff]  ;;  %v1044_v41 = vmul.f32 %v2815_v47, %v2828_v4  ;;  %v1175_v4 = vmul.f32 %v1890_v31, %v3025_v50  ;;  %v1178_v12 = vmul.f32 %v3025_v50, %v2867_v34 }
  0xb7   : > { %1084 = vst.msk [vmem:[%s2107_s25 + $0x20] sm:$0xff] %vm302_vm0, %v1052_v8  ;;  %v969_v8 = vld [vmem:[%s2107_s25 + $0x90] sm:$0xff]  ;;  %v1065_v55 = vadd.f32 %v1033_v39, %v968_v3  ;;  %v1074_v39 = vadd.f32 %v1042_v30, %v977_v44  ;;  %v1182_v44 = vmul.f32 %v3025_v50, %v2893_v45 }
  0xb8   : > { %1085 = vst.msk [vmem:[%s2107_s25 + $0x28] sm:$0x7f] %vm458_vm1, %v1053_v59  ;;  %v1006_v59 = vld [vmem:[%s2102_s22 + $0xb9] sm:$0x7f]  ;;  %v1066_v6 = vadd.f32 %v1034_v7, %v969_v8  ;;  %v979_v52 = vld [vmem:[%s2107_s25 + $0xe0] sm:$0xff]  ;;  %v3201_v3 = vld [vmem:[%s2102_s22 + $0xf1] sm:$0xff] }
  0xb9   : > { %1086 = vst.msk [vmem:[%s2107_s25 + $0x30] sm:$0xff] %vm302_vm0, %v1054_v15  ;;  %v1037_v15 = vmul.f32 %v2815_v47, %v1004_v62  ;;  %v1039_v61 = vmul.f32 %v2815_v47, %v1006_v59  ;;  %v1113_v62 = vld [vmem:[%s2107_s25 + $0x9] sm:$0x7f]  ;;  %v1076_v8 = vadd.f32 %v1044_v41, %v979_v52  ;;  %v821_v59 = vld [vmem:[%s2107_s25 + $0xf9] sm:$0x7f]  ;;  %v1184_v52 = vmul.f32 %v3025_v50, %v2906_v63 }
  0xba   : > { %1087 = vst.msk [vmem:[%s2107_s25 + $0x38] sm:$0x7f] %vm458_vm1, %v1055_v17  ;;  %v1067_v17 = vadd.f32 %v1035_v54, %v970_v56  ;;  %v1264_v54 = vld [vmem:[%s2107_s25] sm:$0xff]  ;;  %v1892_v56 = vld [vmem:[%s2102_s22 + $0x28] sm:$0x7f] }
  0xbb   : > { %1088 = vst.msk [vmem:[%s2107_s25 + $0x40] sm:$0xff] %vm302_vm0, %v1056_v21  ;;  %v1068_v21 = vadd.f32 %v1036_v10, %v971_v13  ;;  %v1069_v1 = vadd.f32 %v1037_v15, %v972_v51  ;;  %v1071_v58 = vadd.f32 %v1039_v61, %v974_v11  ;;  %v981_v13 = vld [vmem:[%s2107_s25 + $0xf0] sm:$0xff]  ;;  %v1894_v15 = vld [vmem:[%s2102_s22 + $0x38] sm:$0x7f]  ;;  %v1177_v32 = vmul.f32 %v1892_v56, %v3025_v50  ;;  %v1896_v61 = vld [vmem:[%s2102_s22 + $0x48] sm:$0x7f] }
  0xbc   : > { %1089 = vst.msk [vmem:[%s2107_s25 + $0x48] sm:$0x7f] %vm458_vm1, %v1057_v23  ;;  %v975_v23 = vld [vmem:[%s2107_s25 + $0xc0] sm:$0xff]  ;;  %v1181_v30 = vmul.f32 %v1896_v61, %v3025_v50 }
  0xbd   : > { %1090 = vst.msk [vmem:[%s2107_s25 + $0x50] sm:$0xff] %vm302_vm0, %v1058_v28  ;;  %v976_v28 = vld [vmem:[%s2107_s25 + $0xc8] sm:$0x7f]  ;;  %v1072_v5 = vadd.f32 %v1040_v18, %v975_v23  ;;  %v1114_v51 = vld [vmem:[%s2107_s25 + $0x11] sm:$0xff]  ;;  %v1179_v18 = vmul.f32 %v1894_v15, %v3025_v50  ;;  %v1180_v23 = vmul.f32 %v3025_v50, %v2880_v42 }
  0xbe   : > { %1091 = vst.msk [vmem:[%s2107_s25 + $0x58] sm:$0x7f] %vm458_vm1, %v1059_v49  ;;  %v1043_v49 = vmul.f32 %v2815_v47, %v1010_v29  ;;  %v1073_v37 = vadd.f32 %v1041_v22, %v976_v28  ;;  %v1898_v22 = vld [vmem:[%s2102_s22 + $0x58] sm:$0x7f] }
  0xbf   : > { %1092 = vst.msk [vmem:[%s2107_s25 + $0x60] sm:$0xff] %vm302_vm0, %v1060_v36  ;;  %v978_v36 = vld [vmem:[%s2107_s25 + $0xd8] sm:$0x7f]  ;;  %v1116_v11 = vld [vmem:[%s2107_s25 + $0x21] sm:$0xff] }
  0xc0   : > { %1093 = vst.msk [vmem:[%s2107_s25 + $0x68] sm:$0x7f] %vm458_vm1, %v1061_v2  ;;  %v1045_v2 = vmul.f32 %v2815_v47, %v1012_v35  ;;  %v1075_v7 = vadd.f32 %v1043_v49, %v978_v36  ;;  %v1208_v35 = vadd.f32 %v1178_v12, %v1116_v11  ;;  %v1900_v49 = vld [vmem:[%s2102_s22 + $0x68] sm:$0x7f]  ;;  %v1183_v36 = vmul.f32 %v1898_v22, %v3025_v50 }
  0xc1   : > { %1094 = vst.msk [vmem:[%s2107_s25 + $0x70] sm:$0xff] %vm302_vm0, %v1062_v19  ;;  %v980_v19 = vld [vmem:[%s2107_s25 + $0xe8] sm:$0x7f]  ;;  %v1118_v28 = vld [vmem:[%s2107_s25 + $0x31] sm:$0xff]  ;;  %v1192_v11 = vmul.f32 %v3025_v50, %v2958_v43 }
  0xc2   : > { %1095 = vst.msk [vmem:[%s2107_s25 + $0x78] sm:$0x7f] %vm458_vm1, %v1063_v48  ;;  %v1325_v48 = vmul.f32 %v3189_v33, %v2841_v14  ;;  %v1077_v10 = vadd.f32 %v1045_v2, %v980_v19  ;;  %v1205_v14 = vadd.f32 %v1175_v4, %v1113_v62  ;;  %v1210_v41 = vadd.f32 %v1180_v23, %v1118_v28  ;;  %v1902_v2 = vld [vmem:[%s2102_s22 + $0x78] sm:$0x7f] }
  0xc3   : > { %1096 = vst.msk [vmem:[%s2107_s25 + $0x80] sm:$0xff] %vm302_vm0, %v1064_v9  ;;  %v886_v9 = vmul.f32 %v2604_v46, %v853_v40  ;;  %v1176_v46 = vmul.f32 %v3025_v50, %v2854_v24  ;;  %v1185_v19 = vmul.f32 %v1900_v49, %v3025_v50  ;;  %v1186_v62 = vmul.f32 %v3025_v50, %v2919_v16 }
  0xc4   : > { %1097 = vst.msk [vmem:[%s2107_s25 + $0x88] sm:$0x7f] %vm458_vm1, %v1065_v55  ;;  %v1046_v55 = vmul.f32 %v2815_v47, %v3201_v3  ;;  %v1194_v28 = vmul.f32 %v3025_v50, %v2971_v60 }
  0xc5   : > { %1098 = vst.msk [vmem:[%s2107_s25 + $0x90] sm:$0xff] %vm302_vm0, %v1066_v6  ;;  %v1355_v6 = vadd.f32 %v1325_v48, %v1264_v54  ;;  %v918_v20 = vadd.f32 %v886_v9, %v821_v59  ;;  %v1206_v29 = vadd.f32 %v1176_v46, %v1114_v51  ;;  %v1904_v48 = vld [vmem:[%s2102_s22 + $0x88] sm:$0x7f]  ;;  %v1187_v9 = vmul.f32 %v1902_v2, %v3025_v50 }
  0xc6   : > { %1099 = vst.msk [vmem:[%s2107_s25 + $0x98] sm:$0x7f] %vm458_vm1, %v1067_v17  ;;  %v1115_v17 = vld [vmem:[%s2107_s25 + $0x19] sm:$0x7f]  ;;  %v1188_v59 = vmul.f32 %v3025_v50, %v2932_v26  ;;  %v1189_v46 = vmul.f32 %v1904_v48, %v3025_v50  ;;  %v1190_v51 = vmul.f32 %v3025_v50, %v2945_v0 }
  0xc7   : > { %1100 = vst.msk [vmem:[%s2107_s25 + $0xa0] sm:$0xff] %vm302_vm0, %v1068_v21  ;;  %v1078_v21 = vadd.f32 %v1046_v55, %v981_v13  ;;  %v1124_v54 = vld [vmem:[%s2107_s25 + $0x61] sm:$0xff]  ;;  %v1906_v55 = vld [vmem:[%s2102_s22 + $0x98] sm:$0x7f] }
  0xc8   : > { %1101 = vst.msk [vmem:[%s2107_s25 + $0xa8] sm:$0x7f] %vm458_vm1, %v1069_v1  ;;  %v1117_v1 = vld [vmem:[%s2107_s25 + $0x29] sm:$0x7f]  ;;  %v1216_v15 = vadd.f32 %v1186_v62, %v1124_v54  ;;  %v1191_v12 = vmul.f32 %v1906_v55, %v3025_v50  ;;  %v1200_v54 = vmul.f32 %v3025_v50, %v3012_v38  ;;  %v1920_v55 = vld [vmem:[%s2102_s22 + $0x18] sm:$0xff] }
  0xc9   : > { %1102 = vst.msk [vmem:[%s2107_s25 + $0xb0] sm:$0xff] %vm302_vm0, %v1070_v25  ;;  %v1207_v25 = vadd.f32 %v1177_v32, %v1115_v17  ;;  %v1209_v31 = vadd.f32 %v1179_v18, %v1117_v1  ;;  %v1126_v13 = vld [vmem:[%s2107_s25 + $0x71] sm:$0xff]  ;;  %v1908_v32 = vld [vmem:[%s2102_s22 + $0xa8] sm:$0x7f] }
  0xca   : > { %1103 = vst.msk [vmem:[%s2107_s25 + $0xb8] sm:$0x7f] %vm458_vm1, %v1071_v58  ;;  %v1119_v58 = vld [vmem:[%s2107_s25 + $0x39] sm:$0x7f]  ;;  %v1218_v61 = vadd.f32 %v1188_v59, %v1126_v13  ;;  %v1193_v23 = vmul.f32 %v1908_v32, %v3025_v50 }
  0xcb   : > { %1104 = vst.msk [vmem:[%s2107_s25 + $0xc0] sm:$0xff] %vm302_vm0, %v1072_v5  ;;  %v1120_v5 = vld [vmem:[%s2107_s25 + $0x41] sm:$0xff]  ;;  %v1211_v40 = vadd.f32 %v1181_v30, %v1119_v58  ;;  %v1910_v18 = vld [vmem:[%s2102_s22 + $0xb8] sm:$0x7f] }
  0xcc   : > { %1105 = vst.msk [vmem:[%s2107_s25 + $0xc8] sm:$0x7f] %vm458_vm1, %v1073_v37  ;;  %v1121_v37 = vld [vmem:[%s2107_s25 + $0x49] sm:$0x7f]  ;;  %v1212_v4 = vadd.f32 %v1182_v44, %v1120_v5  ;;  %v1128_v17 = vld [vmem:[%s2107_s25 + $0x81] sm:$0xff]  ;;  %v1195_v44 = vmul.f32 %v1910_v18, %v3025_v50  ;;  %v1196_v5 = vmul.f32 %v3025_v50, %v2986_v53 }
  0xcd   : > { %1106 = vst.msk [vmem:[%s2107_s25 + $0xd0] sm:$0xff] %vm302_vm0, %v1074_v39  ;;  %v1122_v39 = vld [vmem:[%s2107_s25 + $0x51] sm:$0xff]  ;;  %v1220_v22 = vadd.f32 %v1190_v51, %v1128_v17  ;;  %v1912_v30 = vld [vmem:[%s2102_s22 + $0xc8] sm:$0x7f]  ;;  %v1014_v17 = vld [vmem:[%s2102_s22 + $0xf9] sm:$0x7f] }
  0xce   : > { %1107 = vst.msk [vmem:[%s2107_s25 + $0xd8] sm:$0x7f] %vm458_vm1, %v1075_v7  ;;  %v1123_v7 = vld [vmem:[%s2107_s25 + $0x59] sm:$0x7f]  ;;  %v1214_v56 = vadd.f32 %v1184_v52, %v1122_v39  ;;  %v1130_v1 = vld [vmem:[%s2107_s25 + $0x91] sm:$0xff]  ;;  %v1197_v52 = vmul.f32 %v1912_v30, %v3025_v50  ;;  %v1198_v39 = vmul.f32 %v3025_v50, %v2999_v27  ;;  %v1327_v30 = vmul.f32 %v3189_v33, %v2854_v24  ;;  %v1926_v24 = vld [vmem:[%s2102_s22 + $0x48] sm:$0xff] }
  0xcf   : > { %1108 = vst.msk [vmem:[%s2107_s25 + $0xe0] sm:$0xff] %vm302_vm0, %v1076_v8  ;;  %v1213_v8 = vadd.f32 %v1183_v36, %v1121_v37  ;;  %v1132_v58 = vld [vmem:[%s2107_s25 + $0xa1] sm:$0xff]  ;;  %v1222_v49 = vadd.f32 %v1192_v11, %v1130_v1  ;;  %v1914_v36 = vld [vmem:[%s2102_s22 + $0xd8] sm:$0x7f] }
  0xd0   : > { %1109 = vst.msk [vmem:[%s2107_s25 + $0xe8] sm:$0x7f] %vm458_vm1, %v1077_v10  ;;  %v1125_v10 = vld [vmem:[%s2107_s25 + $0x69] sm:$0x7f]  ;;  %v1224_v2 = vadd.f32 %v1194_v28, %v1132_v58  ;;  %v1199_v62 = vmul.f32 %v1914_v36, %v3025_v50 }
  0xd1   : > { %1235 = vst.msk [vmem:[%s2107_s25 + $0x9] sm:$0x7f] %vm458_vm1, %v1205_v14  ;;  %v1215_v14 = vadd.f32 %v1185_v19, %v1123_v7  ;;  %v1134_v37 = vld [vmem:[%s2107_s25 + $0xb1] sm:$0xff]  ;;  %v1916_v19 = vld [vmem:[%s2102_s22 + $0xe8] sm:$0x7f] }
  0xd2   : > { %1385 = vst.msk [vmem:[%s2107_s25] sm:$0xff] %vm302_vm0, %v1355_v6  ;;  %v1127_v6 = vld [vmem:[%s2107_s25 + $0x79] sm:$0x7f]  ;;  %v1226_v48 = vadd.f32 %v1196_v5, %v1134_v37  ;;  %v1201_v59 = vmul.f32 %v1916_v19, %v3025_v50  ;;  %v1922_v1 = vld [vmem:[%s2102_s22 + $0x28] sm:$0xff]  ;;  %v1329_v5 = vmul.f32 %v3189_v33, %v2867_v34 }
  0xd3   : > { %950 = vst.msk [vmem:[%s2107_s25 + $0xf9] sm:$0x7f] %vm458_vm1, %v918_v20  ;;  %v1217_v20 = vadd.f32 %v1187_v9, %v1125_v10  ;;  %v1136_v7 = vld [vmem:[%s2107_s25 + $0xc1] sm:$0xff]  ;;  %v1918_v9 = vld [vmem:[%s2102_s22 + $0xf8] sm:$0x7f] }
  0xd4   : > { %1110 = vst.msk [vmem:[%s2107_s25 + $0xf0] sm:$0xff] %vm302_vm0, %v1078_v21  ;;  %v1129_v21 = vld [vmem:[%s2107_s25 + $0x89] sm:$0x7f]  ;;  %v1928_v34 = vld [vmem:[%s2102_s22 + $0x58] sm:$0xff] }
  0xd5   : > { %1236 = vst.msk [vmem:[%s2107_s25 + $0x11] sm:$0xff] %vm302_vm0, %v1206_v29  ;;  %v1219_v29 = vadd.f32 %v1189_v46, %v1127_v6  ;;  %v1138_v10 = vld [vmem:[%s2107_s25 + $0xd1] sm:$0xff]  ;;  %v1139_v13 = vld [vmem:[%s2107_s25 + $0xd9] sm:$0x7f]  ;;  %v1202_v46 = vmul.f32 %v3025_v50, %v3033_v57  ;;  %v3358_v6 = vstv %s3308_s5 }
  0xd6   : > { %1237 = vst.msk [vmem:[%s2107_s25 + $0x19] sm:$0x7f] %vm458_vm1, %v1207_v25  ;;  %v1131_v25 = vld [vmem:[%s2107_s25 + $0x99] sm:$0x7f]  ;;  %v1231_v11 = vadd.f32 %v1201_v59, %v1139_v13  ;;  %v1335_v59 = vmul.f32 %v3189_v33, %v2906_v63  ;;  %v1934_v63 = vld [vmem:[%s2102_s22 + $0x88] sm:$0xff] }
  0xd7   : > { %1238 = vst.msk [vmem:[%s2107_s25 + $0x21] sm:$0xff] %vm302_vm0, %v1208_v35  ;;  %v1221_v35 = vadd.f32 %v1191_v12, %v1129_v21  ;;  %v1140_v32 = vld [vmem:[%s2107_s25 + $0xe1] sm:$0xff]  ;;  %v1230_v12 = vadd.f32 %v1200_v54, %v1138_v10  ;;  %v1326_v21 = vmul.f32 %v1920_v55, %v3189_v33 }
  0xd8   : > { %1239 = vst.msk [vmem:[%s2107_s25 + $0x29] sm:$0x7f] %vm458_vm1, %v1209_v31  ;;  %v1133_v31 = vld [vmem:[%s2107_s25 + $0xa9] sm:$0x7f] }
  0xd9   : > { %1240 = vst.msk [vmem:[%s2107_s25 + $0x31] sm:$0xff] %vm302_vm0, %v1210_v41  ;;  %v1223_v41 = vadd.f32 %v1193_v23, %v1131_v25  ;;  %v1265_v18 = vld [vmem:[%s2107_s25 + $0x8] sm:$0xff]  ;;  %v1415_v23 = vld [vmem:[%s2107_s25] sm:$0xff] }
  0xda   : > { %1241 = vst.msk [vmem:[%s2107_s25 + $0x39] sm:$0x7f] %vm458_vm1, %v1211_v40  ;;  %v1135_v40 = vld [vmem:[%s2107_s25 + $0xb9] sm:$0x7f]  ;;  %v1356_v58 = vadd.f32 %v1326_v21, %v1265_v18  ;;  %v1339_v21 = vmul.f32 %v3189_v33, %v2932_v26  ;;  %v1938_v26 = vld [vmem:[%s2102_s22 + $0xa8] sm:$0xff] }
  0xdb   : > { %1242 = vst.msk [vmem:[%s2107_s25 + $0x41] sm:$0xff] %vm302_vm0, %v1212_v4  ;;  %v1225_v4 = vadd.f32 %v1195_v44, %v1133_v31  ;;  %v982_v28 = vld [vmem:[%s2107_s25 + $0xf8] sm:$0x7f] }
  0xdc   : > { %1243 = vst.msk [vmem:[%s2107_s25 + $0x49] sm:$0x7f] %vm458_vm1, %v1213_v8  ;;  %v1137_v8 = vld [vmem:[%s2107_s25 + $0xc9] sm:$0x7f]  ;;  %v1266_v44 = vld [vmem:[%s2107_s25 + $0x10] sm:$0xff] }
  0xdd   : > { %1244 = vst.msk [vmem:[%s2107_s25 + $0x51] sm:$0xff] %vm302_vm0, %v1214_v56  ;;  %v1227_v56 = vadd.f32 %v1197_v52, %v1135_v40  ;;  %v1229_v51 = vadd.f32 %v1199_v62, %v1137_v8  ;;  %v1267_v31 = vld [vmem:[%s2107_s25 + $0x18] sm:$0xff]  ;;  %v1357_v52 = vadd.f32 %v1327_v30, %v1266_v44  ;;  %v1331_v40 = vmul.f32 %v3189_v33, %v2880_v42  ;;  %v1930_v42 = vld [vmem:[%s2102_s22 + $0x68] sm:$0xff] }
  0xde   : > { %1245 = vst.msk [vmem:[%s2107_s25 + $0x59] sm:$0x7f] %vm458_vm1, %v1215_v14  ;;  %v1228_v14 = vadd.f32 %v1198_v39, %v1136_v7  ;;  %v1336_v13 = vmul.f32 %v1930_v42, %v3189_v33 }
  0xdf   : > { %1246 = vst.msk [vmem:[%s2107_s25 + $0x61] sm:$0xff] %vm302_vm0, %v1216_v15  ;;  %v1949_v15 = vld [vmem:[%s2102_s22 + $0x11] sm:$0xff] }
  0xe0   : > { %1247 = vst.msk [vmem:[%s2107_s25 + $0x69] sm:$0x7f] %vm458_vm1, %v1217_v20  ;;  %v1203_v20 = vmul.f32 %v1918_v9, %v3025_v50  ;;  %v1232_v50 = vadd.f32 %v1202_v46, %v1140_v32  ;;  %v1270_v19 = vld [vmem:[%s2107_s25 + $0x30] sm:$0xff]  ;;  %v1334_v9 = vmul.f32 %v1928_v34, %v3189_v33 }
  0xe1   : > { %1248 = vst.msk [vmem:[%s2107_s25 + $0x71] sm:$0xff] %vm302_vm0, %v1218_v61  ;;  %v1141_v61 = vld [vmem:[%s2107_s25 + $0xe9] sm:$0x7f]  ;;  %v1271_v62 = vld [vmem:[%s2107_s25 + $0x38] sm:$0xff] }
  0xe2   : > { %1249 = vst.msk [vmem:[%s2107_s25 + $0x79] sm:$0x7f] %vm458_vm1, %v1219_v29  ;;  %v1476_v29 = vmul.f32 %v1949_v15, %v3358_v6  ;;  %v1233_v25 = vadd.f32 %v1203_v20, %v1141_v61  ;;  %v1272_v54 = vld [vmem:[%s2107_s25 + $0x40] sm:$0xff] }
  0xe3   : > { %1250 = vst.msk [vmem:[%s2107_s25 + $0x81] sm:$0xff] %vm302_vm0, %v1220_v22  ;;  %v1047_v22 = vmul.f32 %v2815_v47, %v1014_v17  ;;  %v1273_v10 = vld [vmem:[%s2107_s25 + $0x48] sm:$0xff] }
  0xe4   : > { %1251 = vst.msk [vmem:[%s2107_s25 + $0x89] sm:$0x7f] %vm458_vm1, %v1221_v35  ;;  %v1924_v35 = vld [vmem:[%s2102_s22 + $0x38] sm:$0xff]  ;;  %v1506_v47 = vadd.f32 %v1476_v29, %v1415_v23  ;;  %v1364_v32 = vadd.f32 %v1334_v9, %v1273_v10  ;;  %v1340_v29 = vmul.f32 %v1934_v63, %v3189_v33  ;;  %v1341_v23 = vmul.f32 %v3189_v33, %v2945_v0 }
  0xe5   : > { %1252 = vst.msk [vmem:[%s2107_s25 + $0x91] sm:$0xff] %vm302_vm0, %v1222_v49  ;;  %v1328_v49 = vmul.f32 %v1922_v1, %v3189_v33  ;;  %v1079_v36 = vadd.f32 %v1047_v22, %v982_v28  ;;  %v1330_v37 = vmul.f32 %v1924_v35, %v3189_v33  ;;  %v1275_v15 = vld [vmem:[%s2107_s25 + $0x58] sm:$0xff] }
  0xe6   : > { %1253 = vst.msk [vmem:[%s2107_s25 + $0x99] sm:$0x7f] %vm458_vm1, %v1223_v41  ;;  %v1268_v41 = vld [vmem:[%s2107_s25 + $0x20] sm:$0xff]  ;;  %v1940_v0 = vld [vmem:[%s2102_s22 + $0xb8] sm:$0xff] }
  0xe7   : > { %1254 = vst.msk [vmem:[%s2107_s25 + $0xa1] sm:$0xff] %vm302_vm0, %v1224_v2  ;;  %v1269_v2 = vld [vmem:[%s2107_s25 + $0x28] sm:$0xff]  ;;  %v1358_v39 = vadd.f32 %v1328_v49, %v1267_v31  ;;  %v1359_v7 = vadd.f32 %v1329_v5, %v1268_v41  ;;  %v1276_v20 = vld [vmem:[%s2107_s25 + $0x60] sm:$0xff] }
  0xe8   : > { %1255 = vst.msk [vmem:[%s2107_s25 + $0xa9] sm:$0x7f] %vm458_vm1, %v1225_v4  ;;  %v1332_v4 = vmul.f32 %v1926_v24, %v3189_v33  ;;  %v1360_v8 = vadd.f32 %v1330_v37, %v1269_v2  ;;  %v1277_v61 = vld [vmem:[%s2107_s25 + $0x68] sm:$0xff]  ;;  %v1278_v18 = vld [vmem:[%s2107_s25 + $0x70] sm:$0xff]  ;;  %v1345_v24 = vmul.f32 %v3189_v33, %v2971_v60  ;;  %v1346_v37 = vmul.f32 %v1940_v0, %v3189_v33  ;;  %v1944_v60 = vld [vmem:[%s2102_s22 + $0xd8] sm:$0xff] }
  0xe9   : > { %1256 = vst.msk [vmem:[%s2107_s25 + $0xb1] sm:$0xff] %vm302_vm0, %v1226_v48  ;;  %v1333_v48 = vmul.f32 %v3189_v33, %v2893_v45  ;;  %v1932_v45 = vld [vmem:[%s2102_s22 + $0x78] sm:$0xff]  ;;  %v1369_v30 = vadd.f32 %v1339_v21, %v1278_v18 }
  0xea   : > { %1257 = vst.msk [vmem:[%s2107_s25 + $0xb9] sm:$0x7f] %vm458_vm1, %v1227_v56  ;;  %v1361_v56 = vadd.f32 %v1331_v40, %v1270_v19  ;;  %v1362_v55 = vadd.f32 %v1332_v4, %v1271_v62  ;;  %v1338_v17 = vmul.f32 %v1932_v45, %v3189_v33  ;;  %v1347_v40 = vmul.f32 %v3189_v33, %v2986_v53  ;;  %v1946_v53 = vld [vmem:[%s2102_s22 + $0xe8] sm:$0xff] }
  0xeb   : > { %1258 = vst.msk [vmem:[%s2107_s25 + $0xc1] sm:$0xff] %vm302_vm0, %v1228_v14  ;;  %v1274_v14 = vld [vmem:[%s2107_s25 + $0x50] sm:$0xff]  ;;  %v1363_v46 = vadd.f32 %v1333_v48, %v1272_v54  ;;  %v1281_v35 = vld [vmem:[%s2107_s25 + $0x88] sm:$0xff]  ;;  %v1349_v62 = vmul.f32 %v3189_v33, %v2999_v27  ;;  %v1948_v27 = vld [vmem:[%s2102_s22 + $0xf8] sm:$0xff]  ;;  %v1352_v45 = vmul.f32 %v1946_v53, %v3189_v33 }
  0xec   : > { %1259 = vst.msk [vmem:[%s2107_s25 + $0xc9] sm:$0x7f] %vm458_vm1, %v1229_v51  ;;  %v1337_v51 = vmul.f32 %v3189_v33, %v2919_v16  ;;  %v1936_v16 = vld [vmem:[%s2102_s22 + $0x98] sm:$0xff]  ;;  %v1368_v22 = vadd.f32 %v1338_v17, %v1277_v61  ;;  %v1282_v49 = vld [vmem:[%s2107_s25 + $0x90] sm:$0xff]  ;;  %v1354_v63 = vmul.f32 %v1948_v27, %v3189_v33 }
  0xed   : > { %1260 = vst.msk [vmem:[%s2107_s25 + $0xd1] sm:$0xff] %vm302_vm0, %v1230_v12  ;;  %v1365_v12 = vadd.f32 %v1335_v59, %v1274_v14  ;;  %v1342_v28 = vmul.f32 %v1936_v16, %v3189_v33  ;;  %v1283_v5 = vld [vmem:[%s2107_s25 + $0x98] sm:$0xff] }
  0xee   : > { %1261 = vst.msk [vmem:[%s2107_s25 + $0xd9] sm:$0x7f] %vm458_vm1, %v1231_v11  ;;  %v1366_v11 = vadd.f32 %v1336_v13, %v1275_v15  ;;  %v1367_v1 = vadd.f32 %v1337_v51, %v1276_v20  ;;  %v1284_v41 = vld [vmem:[%s2107_s25 + $0xa0] sm:$0xff]  ;;  %v1954_v16 = vld [vmem:[%s2102_s22 + $0x39] sm:$0x7f] }
  0xef   : > { %1262 = vst.msk [vmem:[%s2107_s25 + $0xe1] sm:$0xff] %vm302_vm0, %v1232_v50  ;;  %v1279_v50 = vld [vmem:[%s2107_s25 + $0x78] sm:$0xff]  ;;  %v1285_v2 = vld [vmem:[%s2107_s25 + $0xa8] sm:$0xff]  ;;  %v1375_v4 = vadd.f32 %v1345_v24, %v1284_v41 }
  0xf0   : > { %1263 = vst.msk [vmem:[%s2107_s25 + $0xe9] sm:$0x7f] %vm458_vm1, %v1233_v25  ;;  %v1280_v25 = vld [vmem:[%s2107_s25 + $0x80] sm:$0xff]  ;;  %v1370_v44 = vadd.f32 %v1340_v29, %v1279_v50  ;;  %v1376_v48 = vadd.f32 %v1346_v37, %v1285_v2  ;;  %v1960_v37 = vld [vmem:[%s2102_s22 + $0x69] sm:$0x7f] }
  0xf1   : > { %1386 = vst.msk [vmem:[%s2107_s25 + $0x8] sm:$0xff] %vm302_vm0, %v1356_v58  ;;  %v1343_v58 = vmul.f32 %v3189_v33, %v2958_v43  ;;  %v1371_v31 = vadd.f32 %v1341_v23, %v1280_v25  ;;  %v1942_v43 = vld [vmem:[%s2102_s22 + $0xc8] sm:$0xff]  ;;  %v1487_v53 = vmul.f32 %v1960_v37, %v3358_v6 }
  0xf2   : > { %1536 = vst.msk [vmem:[%s2107_s25] sm:$0xff] %vm302_vm0, %v1506_v47  ;;  %v1344_v47 = vmul.f32 %v1938_v26, %v3189_v33  ;;  %v1348_v19 = vmul.f32 %v1942_v43, %v3189_v33  ;;  %v1288_v42 = vld [vmem:[%s2107_s25 + $0xc0] sm:$0xff] }
  0xf3   : > { %1111 = vst.msk [vmem:[%s2107_s25 + $0xf8] sm:$0x7f] %vm458_vm1, %v1079_v36  ;;  %v1372_v36 = vadd.f32 %v1342_v28, %v1281_v35  ;;  %v1289_v9 = vld [vmem:[%s2107_s25 + $0xc8] sm:$0xff]  ;;  %v1379_v14 = vadd.f32 %v1349_v62, %v1288_v42  ;;  %v1957_v35 = vld [vmem:[%s2102_s22 + $0x51] sm:$0xff] }
  0xf4   : > { %1387 = vst.msk [vmem:[%s2107_s25 + $0x10] sm:$0xff] %vm302_vm0, %v1357_v52  ;;  %v1373_v52 = vadd.f32 %v1343_v58, %v1282_v49  ;;  %v1374_v34 = vadd.f32 %v1344_v47, %v1283_v5  ;;  %v1290_v59 = vld [vmem:[%s2107_s25 + $0xd0] sm:$0xff]  ;;  %v1958_v49 = vld [vmem:[%s2102_s22 + $0x59] sm:$0x7f]  ;;  %v1959_v24 = vld [vmem:[%s2102_s22 + $0x61] sm:$0xff]  ;;  %v1484_v41 = vmul.f32 %v1957_v35, %v3358_v6 }
  0xf5   : > { %1388 = vst.msk [vmem:[%s2107_s25 + $0x18] sm:$0xff] %vm302_vm0, %v1358_v39  ;;  %v1286_v39 = vld [vmem:[%s2107_s25 + $0xb0] sm:$0xff]  ;;  %v1291_v13 = vld [vmem:[%s2107_s25 + $0xd8] sm:$0xff] }
  0xf6   : > { %1389 = vst.msk [vmem:[%s2107_s25 + $0x20] sm:$0xff] %vm302_vm0, %v1359_v7  ;;  %v1287_v7 = vld [vmem:[%s2107_s25 + $0xb8] sm:$0xff]  ;;  %v1377_v54 = vadd.f32 %v1347_v40, %v1286_v39  ;;  %v1292_v51 = vld [vmem:[%s2107_s25 + $0xe0] sm:$0xff]  ;;  %v1382_v61 = vadd.f32 %v1352_v45, %v1291_v13  ;;  %v1485_v40 = vmul.f32 %v1958_v49, %v3358_v6 }
  0xf7   : > { %1390 = vst.msk [vmem:[%s2107_s25 + $0x28] sm:$0xff] %vm302_vm0, %v1360_v8  ;;  %v1350_v8 = vmul.f32 %v1944_v60, %v3189_v33  ;;  %v1378_v10 = vadd.f32 %v1348_v19, %v1287_v7  ;;  %v1293_v17 = vld [vmem:[%s2107_s25 + $0xe8] sm:$0xff]  ;;  %v1961_v60 = vld [vmem:[%s2102_s22 + $0x71] sm:$0xff]  ;;  %v1486_v19 = vmul.f32 %v1959_v24, %v3358_v6  ;;  %v1966_v13 = vld [vmem:[%s2102_s22 + $0x99] sm:$0x7f] }
  0xf8   : > { %1391 = vst.msk [vmem:[%s2107_s25 + $0x30] sm:$0xff] %vm302_vm0, %v1361_v56  ;;  %v1351_v56 = vmul.f32 %v3189_v33, %v3012_v38  ;;  %v1353_v38 = vmul.f32 %v3189_v33, %v3033_v57  ;;  %v1416_v21 = vld [vmem:[%s2107_s25 + $0x8] sm:$0x7f]  ;;  %v1384_v50 = vadd.f32 %v1354_v63, %v1293_v17 }
  0xf9   : > { %1392 = vst.msk [vmem:[%s2107_s25 + $0x38] sm:$0xff] %vm302_vm0, %v1362_v55  ;;  %v1950_v55 = vld [vmem:[%s2102_s22 + $0x19] sm:$0x7f]  ;;  %v1380_v15 = vadd.f32 %v1350_v8, %v1289_v9  ;;  %v1964_v9 = vld [vmem:[%s2102_s22 + $0x89] sm:$0x7f] }
  0xfa   : > { %1393 = vst.msk [vmem:[%s2107_s25 + $0x40] sm:$0xff] %vm302_vm0, %v1363_v46  ;;  %v1951_v46 = vld [vmem:[%s2102_s22 + $0x21] sm:$0xff]  ;;  %v1381_v20 = vadd.f32 %v1351_v56, %v1290_v59  ;;  %v1477_v57 = vmul.f32 %v1950_v55, %v3358_v6  ;;  %v1965_v59 = vld [vmem:[%s2102_s22 + $0x91] sm:$0xff]  ;;  %v1968_v17 = vld [vmem:[%s2102_s22 + $0xa9] sm:$0x7f] }
  0xfb   : > { %1394 = vst.msk [vmem:[%s2107_s25 + $0x48] sm:$0xff] %vm302_vm0, %v1364_v32  ;;  %v1952_v32 = vld [vmem:[%s2102_s22 + $0x29] sm:$0x7f]  ;;  %v1478_v33 = vmul.f32 %v1951_v46, %v3358_v6  ;;  %v1417_v18 = vld [vmem:[%s2107_s25 + $0x10] sm:$0xff] }
  0xfc   : > { %1395 = vst.msk [vmem:[%s2107_s25 + $0x50] sm:$0xff] %vm302_vm0, %v1365_v12  ;;  %v1953_v12 = vld [vmem:[%s2102_s22 + $0x31] sm:$0xff]  ;;  %v1479_v29 = vmul.f32 %v1952_v32, %v3358_v6  ;;  %v1507_v25 = vadd.f32 %v1477_v57, %v1416_v21 }
  0xfd   : > { %1396 = vst.msk [vmem:[%s2107_s25 + $0x58] sm:$0xff] %vm302_vm0, %v1366_v11  ;;  %v1383_v11 = vadd.f32 %v1353_v38, %v1292_v51  ;;  %v1418_v23 = vld [vmem:[%s2107_s25 + $0x18] sm:$0x7f]  ;;  %v1480_v26 = vmul.f32 %v1953_v12, %v3358_v6  ;;  %v1419_v28 = vld [vmem:[%s2107_s25 + $0x20] sm:$0xff]  ;;  %v1508_v58 = vadd.f32 %v1478_v33, %v1417_v18 }
  0xfe   : > { %1397 = vst.msk [vmem:[%s2107_s25 + $0x60] sm:$0xff] %vm302_vm0, %v1367_v1  ;;  %v1955_v1 = vld [vmem:[%s2102_s22 + $0x41] sm:$0xff]  ;;  %v1509_v47 = vadd.f32 %v1479_v29, %v1418_v23  ;;  %v1969_v21 = vld [vmem:[%s2102_s22 + $0xb1] sm:$0xff]  ;;  %v1970_v18 = vld [vmem:[%s2102_s22 + $0xb9] sm:$0x7f] }
  0xff   : > { %1398 = vst.msk [vmem:[%s2107_s25 + $0x68] sm:$0xff] %vm302_vm0, %v1368_v22  ;;  %v1956_v22 = vld [vmem:[%s2102_s22 + $0x49] sm:$0x7f]  ;;  %v1510_v43 = vadd.f32 %v1480_v26, %v1419_v28  ;;  %v1967_v51 = vld [vmem:[%s2102_s22 + $0xa1] sm:$0xff] }
 0x100   : > { %1399 = vst.msk [vmem:[%s2107_s25 + $0x70] sm:$0xff] %vm302_vm0, %v1369_v30  ;;  %v1481_v30 = vmul.f32 %v1954_v16, %v3358_v6  ;;  %v1420_v0 = vld [vmem:[%s2107_s25 + $0x28] sm:$0x7f]  ;;  %v1483_v5 = vmul.f32 %v1956_v22, %v3358_v6 }
 0x101   : > { %1400 = vst.msk [vmem:[%s2107_s25 + $0x78] sm:$0xff] %vm302_vm0, %v1370_v44  ;;  %v1482_v44 = vmul.f32 %v1955_v1, %v3358_v6  ;;  %v1423_v2 = vld [vmem:[%s2107_s25 + $0x40] sm:$0xff]  ;;  %v1972_v28 = vld [vmem:[%s2102_s22 + $0xc9] sm:$0x7f] }
 0x102   : > { %1401 = vst.msk [vmem:[%s2107_s25 + $0x80] sm:$0xff] %vm302_vm0, %v1371_v31  ;;  %v1421_v31 = vld [vmem:[%s2107_s25 + $0x30] sm:$0xff]  ;;  %v1424_v39 = vld [vmem:[%s2107_s25 + $0x48] sm:$0x7f]  ;;  %v1514_v42 = vadd.f32 %v1484_v41, %v1423_v2 }
 0x103   : > { %1402 = vst.msk [vmem:[%s2107_s25 + $0x88] sm:$0xff] %vm302_vm0, %v1372_v36  ;;  %v1422_v36 = vld [vmem:[%s2107_s25 + $0x38] sm:$0x7f]  ;;  %v1425_v62 = vld [vmem:[%s2107_s25 + $0x50] sm:$0xff]  ;;  %v1515_v56 = vadd.f32 %v1485_v40, %v1424_v39  ;;  %v1971_v23 = vld [vmem:[%s2102_s22 + $0xc1] sm:$0xff] }
 0x104   : > { %1403 = vst.msk [vmem:[%s2107_s25 + $0x90] sm:$0xff] %vm302_vm0, %v1373_v52  ;;  %v1511_v52 = vadd.f32 %v1481_v30, %v1420_v0  ;;  %v1513_v7 = vadd.f32 %v1483_v5, %v1422_v36  ;;  %v1426_v8 = vld [vmem:[%s2107_s25 + $0x58] sm:$0x7f]  ;;  %v1516_v45 = vadd.f32 %v1486_v19, %v1425_v62  ;;  %v1975_v36 = vld [vmem:[%s2102_s22 + $0xe1] sm:$0xff]  ;;  %v1976_v2 = vld [vmem:[%s2102_s22 + $0xe9] sm:$0x7f] }
 0x105   : > { %1404 = vst.msk [vmem:[%s2107_s25 + $0x98] sm:$0xff] %vm302_vm0, %v1374_v34  ;;  %v1512_v34 = vadd.f32 %v1482_v44, %v1421_v31  ;;  %v1427_v27 = vld [vmem:[%s2107_s25 + $0x60] sm:$0xff]  ;;  %v1517_v38 = vadd.f32 %v1487_v53, %v1426_v8  ;;  %v1973_v0 = vld [vmem:[%s2102_s22 + $0xd1] sm:$0xff]  ;;  %v1974_v31 = vld [vmem:[%s2102_s22 + $0xd9] sm:$0x7f] }
 0x106   : > { %1405 = vst.msk [vmem:[%s2107_s25 + $0xa0] sm:$0xff] %vm302_vm0, %v1375_v4  ;;  %v1962_v4 = vld [vmem:[%s2102_s22 + $0x79] sm:$0x7f]  ;;  %v1428_v55 = vld [vmem:[%s2107_s25 + $0x68] sm:$0x7f] }
 0x107   : > { %1406 = vst.msk [vmem:[%s2107_s25 + $0xa8] sm:$0xff] %vm302_vm0, %v1376_v48  ;;  %v1963_v48 = vld [vmem:[%s2102_s22 + $0x81] sm:$0xff]  ;;  %v1429_v46 = vld [vmem:[%s2107_s25 + $0x70] sm:$0xff] }
 0x108   : > { %1407 = vst.msk [vmem:[%s2107_s25 + $0xb0] sm:$0xff] %vm302_vm0, %v1377_v54  ;;  %v1488_v54 = vmul.f32 %v1961_v60, %v3358_v6  ;;  %v1430_v32 = vld [vmem:[%s2107_s25 + $0x78] sm:$0x7f] }
 0x109   : > { %1408 = vst.msk [vmem:[%s2107_s25 + $0xb8] sm:$0xff] %vm302_vm0, %v1378_v10  ;;  %v1489_v10 = vmul.f32 %v1962_v4, %v3358_v6  ;;  %v1431_v12 = vld [vmem:[%s2107_s25 + $0x80] sm:$0xff]  ;;  %v1502_v4 = vmul.f32 %v1975_v36, %v3358_v6 }
 0x10a   : > { %1409 = vst.msk [vmem:[%s2107_s25 + $0xc0] sm:$0xff] %vm302_vm0, %v1379_v14  ;;  %v1490_v14 = vmul.f32 %v1963_v48, %v3358_v6  ;;  %v1518_v63 = vadd.f32 %v1488_v54, %v1427_v27  ;;  %v1432_v16 = vld [vmem:[%s2107_s25 + $0x88] sm:$0x7f]  ;;  %v1503_v48 = vmul.f32 %v1976_v2, %v3358_v6  ;;  %v1504_v54 = vmul.f32 %v3358_v6, %v3201_v3 }
 0x10b   : > { %1410 = vst.msk [vmem:[%s2107_s25 + $0xc8] sm:$0xff] %vm302_vm0, %v1380_v15  ;;  %v1491_v15 = vmul.f32 %v1964_v9, %v3358_v6  ;;  %v1519_v57 = vadd.f32 %v1489_v10, %v1428_v55  ;;  %v1433_v1 = vld [vmem:[%s2107_s25 + $0x90] sm:$0xff] }
 0x10c   : > { %1411 = vst.msk [vmem:[%s2107_s25 + $0xd0] sm:$0xff] %vm302_vm0, %v1381_v20  ;;  %v1492_v20 = vmul.f32 %v1965_v59, %v3358_v6  ;;  %v1520_v33 = vadd.f32 %v1490_v14, %v1429_v46  ;;  %v1434_v22 = vld [vmem:[%s2107_s25 + $0x98] sm:$0x7f] }
 0x10d   : > { %1412 = vst.msk [vmem:[%s2107_s25 + $0xd8] sm:$0xff] %vm302_vm0, %v1382_v61  ;;  %v1493_v61 = vmul.f32 %v1966_v13, %v3358_v6  ;;  %v1521_v29 = vadd.f32 %v1491_v15, %v1430_v32  ;;  %v1435_v35 = vld [vmem:[%s2107_s25 + $0xa0] sm:$0xff] }
 0x10e   : > { %1413 = vst.msk [vmem:[%s2107_s25 + $0xe0] sm:$0xff] %vm302_vm0, %v1383_v11  ;;  %v1494_v11 = vmul.f32 %v1967_v51, %v3358_v6  ;;  %v1522_v26 = vadd.f32 %v1492_v20, %v1431_v12  ;;  %v1436_v49 = vld [vmem:[%s2107_s25 + $0xa8] sm:$0x7f] }
 0x10f   : > { %1414 = vst.msk [vmem:[%s2107_s25 + $0xe8] sm:$0xff] %vm302_vm0, %v1384_v50  ;;  %v1495_v50 = vmul.f32 %v1968_v17, %v3358_v6  ;;  %v1523_v30 = vadd.f32 %v1493_v61, %v1432_v16  ;;  %v1437_v24 = vld [vmem:[%s2107_s25 + $0xb0] sm:$0xff] }
 0x110   : > { %1537 = vst.msk [vmem:[%s2107_s25 + $0x8] sm:$0x7f] %vm458_vm1, %v1507_v25  ;;  %v1496_v25 = vmul.f32 %v1969_v21, %v3358_v6  ;;  %v1524_v44 = vadd.f32 %v1494_v11, %v1433_v1  ;;  %v1438_v37 = vld [vmem:[%s2107_s25 + $0xb8] sm:$0x7f] }
 0x111   : > { %1538 = vst.msk [vmem:[%s2107_s25 + $0x10] sm:$0xff] %vm302_vm0, %v1508_v58  ;;  %v1497_v58 = vmul.f32 %v1970_v18, %v3358_v6  ;;  %v1525_v5 = vadd.f32 %v1495_v50, %v1434_v22  ;;  %v1439_v60 = vld [vmem:[%s2107_s25 + $0xc0] sm:$0xff] }
 0x112   : > { %1539 = vst.msk [vmem:[%s2107_s25 + $0x18] sm:$0x7f] %vm458_vm1, %v1509_v47  ;;  %v1498_v47 = vmul.f32 %v1971_v23, %v3358_v6  ;;  %v1526_v41 = vadd.f32 %v1496_v25, %v1435_v35  ;;  %v1440_v19 = vld [vmem:[%s2107_s25 + $0xc8] sm:$0x7f] }
 0x113   : > { %1540 = vst.msk [vmem:[%s2107_s25 + $0x20] sm:$0xff] %vm302_vm0, %v1510_v43  ;;  %v1499_v43 = vmul.f32 %v1972_v28, %v3358_v6  ;;  %v1527_v40 = vadd.f32 %v1497_v58, %v1436_v49  ;;  %v1441_v53 = vld [vmem:[%s2107_s25 + $0xd0] sm:$0xff] }
 0x114   : > { %1541 = vst.msk [vmem:[%s2107_s25 + $0x28] sm:$0x7f] %vm458_vm1, %v1511_v52  ;;  %v1500_v52 = vmul.f32 %v1973_v0, %v3358_v6  ;;  %v1528_v39 = vadd.f32 %v1498_v47, %v1437_v24  ;;  %v1442_v8 = vld [vmem:[%s2107_s25 + $0xd8] sm:$0x7f]  ;;  %v1532_v10 = vadd.f32 %v1502_v4, %v1441_v53 }
 0x115   : > { %1542 = vst.msk [vmem:[%s2107_s25 + $0x30] sm:$0xff] %vm302_vm0, %v1512_v34  ;;  %v1501_v34 = vmul.f32 %v1974_v31, %v3358_v6  ;;  %v1529_v62 = vadd.f32 %v1499_v43, %v1438_v37 }
 0x116   : > { %1543 = vst.msk [vmem:[%s2107_s25 + $0x38] sm:$0x7f] %vm458_vm1, %v1513_v7  ;;  %v1978_v7 = vld [vmem:[%s2102_s22 + $0xf9] sm:$0x7f]  ;;  %v1444_v59 = vld [vmem:[%s2107_s25 + $0xe8] sm:$0x7f] }
 0x117   : > { %1544 = vst.msk [vmem:[%s2107_s25 + $0x40] sm:$0xff] %vm302_vm0, %v1514_v42  ;;  %v1530_v42 = vadd.f32 %v1500_v52, %v1439_v60  ;;  %v1531_v9 = vadd.f32 %v1501_v34, %v1440_v19  ;;  %v1505_v27 = vmul.f32 %v1978_v7, %v3358_v6 }
 0x118   : > { %1545 = vst.msk [vmem:[%s2107_s25 + $0x48] sm:$0x7f] %vm458_vm1, %v1515_v56  ;;  %v1443_v56 = vld [vmem:[%s2107_s25 + $0xe0] sm:$0xff] }
 0x119   : > { %1546 = vst.msk [vmem:[%s2107_s25 + $0x50] sm:$0xff] %vm302_vm0, %v1516_v45  ;;  %v1533_v45 = vadd.f32 %v1503_v48, %v1442_v8  ;;  %v1534_v55 = vadd.f32 %v1504_v54, %v1443_v56  ;;  %v1535_v3 = vadd.f32 %v1505_v27, %v1444_v59 }
 0x11a   : > { %1547 = vst.msk [vmem:[%s2107_s25 + $0x58] sm:$0x7f] %vm458_vm1, %v1517_v38 }
 0x11b   : > { %1548 = vst.msk [vmem:[%s2107_s25 + $0x60] sm:$0xff] %vm302_vm0, %v1518_v63 }
 0x11c   : > { %1549 = vst.msk [vmem:[%s2107_s25 + $0x68] sm:$0x7f] %vm458_vm1, %v1519_v57 }
 0x11d   : > { %1550 = vst.msk [vmem:[%s2107_s25 + $0x70] sm:$0xff] %vm302_vm0, %v1520_v33 }
 0x11e   : > { %1551 = vst.msk [vmem:[%s2107_s25 + $0x78] sm:$0x7f] %vm458_vm1, %v1521_v29 }
 0x11f   : > { %1552 = vst.msk [vmem:[%s2107_s25 + $0x80] sm:$0xff] %vm302_vm0, %v1522_v26 }
 0x120   : > { %1553 = vst.msk [vmem:[%s2107_s25 + $0x88] sm:$0x7f] %vm458_vm1, %v1523_v30 }
 0x121   : > { %1554 = vst.msk [vmem:[%s2107_s25 + $0x90] sm:$0xff] %vm302_vm0, %v1524_v44 }
 0x122   : > { %1555 = vst.msk [vmem:[%s2107_s25 + $0x98] sm:$0x7f] %vm458_vm1, %v1525_v5 }
 0x123   : > { %1556 = vst.msk [vmem:[%s2107_s25 + $0xa0] sm:$0xff] %vm302_vm0, %v1526_v41 }
 0x124   : > { %1557 = vst.msk [vmem:[%s2107_s25 + $0xa8] sm:$0x7f] %vm458_vm1, %v1527_v40 }
 0x125   : > { %1558 = vst.msk [vmem:[%s2107_s25 + $0xb0] sm:$0xff] %vm302_vm0, %v1528_v39 }
 0x126   : > { %1559 = vst.msk [vmem:[%s2107_s25 + $0xb8] sm:$0x7f] %vm458_vm1, %v1529_v62 }
 0x127   : > { %1560 = vst.msk [vmem:[%s2107_s25 + $0xc0] sm:$0xff] %vm302_vm0, %v1530_v42 }
 0x128   : > { %1561 = vst.msk [vmem:[%s2107_s25 + $0xc8] sm:$0x7f] %vm458_vm1, %v1531_v9 }
 0x129   : > { %1562 = vst.msk [vmem:[%s2107_s25 + $0xd0] sm:$0xff] %vm302_vm0, %v1532_v10 }
 0x12a   : > { %1563 = vst.msk [vmem:[%s2107_s25 + $0xd8] sm:$0x7f] %vm458_vm1, %v1533_v45 }
 0x12b   : > { %1564 = vst.msk [vmem:[%s2107_s25 + $0xe0] sm:$0xff] %vm302_vm0, %v1534_v55 }
 0x12c   : > { %1565 = vst.msk [vmem:[%s2107_s25 + $0xe8] sm:$0x7f] %vm458_vm1, %v1535_v3 }
 0x12d PF: > { %s13_s11 = sadd.s32 1, %s2059_s11   ;;  %s3691_s9 = smov %s2055_s10 }
 0x12e   : > { %p10_p8 = scmp.ge.s32.totalorder %s13_s11, 4   ;;  %s3692_s10 = smov %s3694_s13 }
 0x130   :  { %12 = sbr.rel (!%p10_p8) target bundleno = 2 (0x2), region = 65 }
 0x135   :  { %1604 = vsyncpa [#allocation3], 1 }
 0x136   :  { %1606 = vsyncpa [#allocation3 + $0x1], 1 }

</bundles_post_ra>
